<compile_context>
chip_gen: v7x
topology: tpu7x:2x2x1
jax: 0.10.0
libtpu: 0.0.40
codegen_flags: <defaults>
</compile_context>

<pallas_src>
import functools

import jax
import jax.numpy as jnp
from jax.experimental import pallas as pl
from jax.experimental.pallas import tpu as pltpu

_LANE = 128  # pad channel dims to a multiple of the TPU lane width


def _round_up(x, m):
    return ((x + m - 1) // m) * m


def _vmem_estimate_bytes(th, W, cin_p, cmid_p, cout_p, act_bytes):
    """Rough per-grid-step VMEM working set (double-buffered in/out + scratch)."""
    in_tile = (th + 4) * (W + 2) * cin_p * act_bytes
    mid = (th + 2) * (W + 2) * cmid_p * act_bytes
    out_tile = th * W * cout_p * 4
    wts = 9 * (cin_p * cmid_p + cmid_p * cout_p) * act_bytes
    patches = ((th + 2) * W * 9 * cin_p + th * W * 9 * cmid_p) * act_bytes
    acc = ((th + 2) * W * cmid_p + th * W * cout_p) * 4
    return 2 * in_tile + 2 * out_tile + mid + 2 * wts + patches + acc


def _pick_tile_rows(H, W, cin_p, cmid_p, cout_p, act_bytes,
                    budget=24 * 1024 * 1024):
    """Largest row tile (multiple of 8, dividing H) fitting a v7x-safe VMEM budget."""
    cands = [th for th in range(H, 0, -1)
             if H % th == 0 and (th == H or th % 8 == 0)]
    for th in cands:
        if _vmem_estimate_bytes(th, W, cin_p, cmid_p, cout_p, act_bytes) <= budget:
            return th
    return cands[-1]


def _double_conv_kernel(x_ref, w1_ref, t1_ref, w2_ref, t2_ref, o_ref, mid_ref,
                        *, img_h, tile_rows):
    """One (batch, row-tile) step.

    x_ref  : (TH+4, W+2, Cin_p)   padded input row tile (+2-row halo each side)
    w1_ref : (9*Cin_p, Cmid_p)    conv1 weights, BN1 scale folded in
    t1_ref : (1, Cmid_p)          folded shift (f32)
    w2_ref : (9*Cmid_p, Cout_p)
    t2_ref : (1, Cout_p)
    o_ref  : (TH, W, Cout_p)      output row tile (lane-dense, Cout_p % 128 == 0)
    mid_ref: (TH+2, W+2, Cmid_p)  VMEM scratch for the padded intermediate
    """
    TH = tile_rows
    Hm = TH + 2                       # intermediate rows incl. 1-row halo each side
    _, W2, cin_p = x_ref.shape
    W = W2 - 2
    cmid_p = mid_ref.shape[-1]
    cout_p = o_ref.shape[-1]

    r0 = pl.program_id(1) * TH        # first output row of this tile

    # ---- conv1 (im2col -> single MXU matmul) + folded BN1 + ReLU ----
    taps1 = [x_ref[dy:dy + Hm, dx:dx + W, :]
             for dy in range(3) for dx in range(3)]
    patches1 = jnp.concatenate(taps1, axis=-1).reshape(Hm * W, 9 * cin_p)
    acc1 = jnp.dot(patches1, w1_ref[...], preferred_element_type=jnp.float32)
    h1 = jnp.maximum(acc1 + t1_ref[...], 0.0).reshape(Hm, W, cmid_p)

    # Park the intermediate in VMEM scratch; zero only the two W-border columns.
    mid_ref[:, 0:1, :] = jnp.zeros((Hm, 1, cmid_p), mid_ref.dtype)
    mid_ref[:, W + 1:W + 2, :] = jnp.zeros((Hm, 1, cmid_p), mid_ref.dtype)
    mid_ref[:, 1:W + 1, :] = h1.astype(mid_ref.dtype)

    # Halo rows of the intermediate that fall outside the image are conv2's
    # zero padding in H -> zero them (only ever the first / last local row).
    @pl.when(r0 == 0)
    def _():
        mid_ref[0:1, :, :] = jnp.zeros((1, W + 2, cmid_p), mid_ref.dtype)

    @pl.when(r0 + TH == img_h)
    def _():
        mid_ref[Hm - 1:Hm, :, :] = jnp.zeros((1, W + 2, cmid_p), mid_ref.dtype)

    # ---- conv2 (im2col -> single MXU matmul) + folded BN2 + ReLU ----
    taps2 = [mid_ref[dy:dy + TH, dx:dx + W, :]
             for dy in range(3) for dx in range(3)]
    patches2 = jnp.concatenate(taps2, axis=-1).reshape(TH * W, 9 * cmid_p)
    acc2 = jnp.dot(patches2, w2_ref[...], preferred_element_type=jnp.float32)
    h2 = jnp.maximum(acc2 + t2_ref[...], 0.0)
    o_ref[...] = h2.reshape(TH, W, cout_p).astype(o_ref.dtype)


@functools.partial(jax.jit, static_argnames=("compute_dtype", "tile_rows"))
def double_conv_pallas(x_nchw, params, *, eps=1e-5,
                       compute_dtype=jnp.float32, tile_rows=None):
    """x_nchw: (N, Cin, H, W) float32. Returns (N, Cout, H, W)."""
    (w1, b1, g1, be1, rm1, rv1,
     w2, b2, g2, be2, rm2, rv2) = params

    N, Cin, H, W = x_nchw.shape
    Cmid = w1.shape[0]
    Cout = w2.shape[0]

    cin_p = _round_up(Cin, _LANE)
    cmid_p = _round_up(Cmid, _LANE)
    cout_p = _round_up(Cout, _LANE)

    act_bytes = jnp.dtype(compute_dtype).itemsize
    if tile_rows is None:
        TH = _pick_tile_rows(H, W, cin_p, cmid_p, cout_p, act_bytes)
    else:
        TH = int(tile_rows)
        if H % TH or (TH != H and TH % 8):
            raise ValueError(f"tile_rows={TH} must divide H={H} and be a multiple of 8")
    NT = H // TH

    # ---- fold conv bias + eval-mode BN into per-channel scale (-> weights) and shift ----
    s1 = g1 / jnp.sqrt(rv1 + eps)
    t1 = (b1 - rm1) * s1 + be1
    s2 = g2 / jnp.sqrt(rv2 + eps)
    t2 = (b2 - rm2) * s2 + be2

    def pack_weights(w, s, ci, ci_p, co, co_p):
        wk = jnp.transpose(w, (2, 3, 1, 0)) * s[None, None, None, :]   # OIHW -> HWIO, scaled
        wk = jnp.pad(wk, ((0, 0), (0, 0), (0, ci_p - ci), (0, co_p - co)))
        return wk.reshape(9 * ci_p, co_p).astype(compute_dtype)

    w1_mat = pack_weights(w1, s1, Cin, cin_p, Cmid, cmid_p)
    w2_mat = pack_weights(w2, s2, Cmid, cmid_p, Cout, cout_p)
    t1_p = jnp.pad(t1, (0, cmid_p - Cmid)).reshape(1, cmid_p).astype(jnp.float32)
    t2_p = jnp.pad(t2, (0, cout_p - Cout)).reshape(1, cout_p).astype(jnp.float32)

    # ---- NCHW -> NHWC, pad channels to lane multiples, pad H by 2 / W by 1,
    #      cut overlapping row tiles (+2-row halo each side) ----
    x = jnp.transpose(x_nchw, (0, 2, 3, 1))
    xp = jnp.pad(x, ((0, 0), (2, 2), (1, 1), (0, cin_p - Cin))).astype(compute_dtype)
    tiles = jnp.concatenate(
        [xp[:, t * TH:t * TH + TH + 4][:, None] for t in range(NT)], axis=1)
    tiles = tiles.reshape(N * NT, TH + 4, W + 2, cin_p)

    est = _vmem_estimate_bytes(TH, W, cin_p, cmid_p, cout_p, act_bytes)
    vmem_limit = int(min(max(2 * est, 32 * 2 ** 20), 96 * 2 ** 20))

    kernel = functools.partial(_double_conv_kernel, img_h=H, tile_rows=TH)

    out = pl.pallas_call(
        kernel,
        out_shape=jax.ShapeDtypeStruct((N, H, W, cout_p), x_nchw.dtype),
        grid_spec=pltpu.PrefetchScalarGridSpec(
            num_scalar_prefetch=0,
            grid=(N, NT),
            in_specs=[
                pl.BlockSpec((pl.Squeezed(), TH + 4, W + 2, cin_p),
                             lambda n, t: (n * NT + t, 0, 0, 0)),
                # NOTE: weight blocks are constant across the grid so Pallas only
                # DMAs them once; for very large channel counts they should be
                # single-buffered (manual DMA / Buffered(1)) to reclaim VMEM.
                pl.BlockSpec((9 * cin_p, cmid_p), lambda n, t: (0, 0)),
                pl.BlockSpec((1, cmid_p), lambda n, t: (0, 0)),
                pl.BlockSpec((9 * cmid_p, cout_p), lambda n, t: (0, 0)),
                pl.BlockSpec((1, cout_p), lambda n, t: (0, 0)),
            ],
            out_specs=pl.BlockSpec((pl.Squeezed(), TH, W, cout_p),
                                   lambda n, t: (n, t, 0, 0)),
            scratch_shapes=[pltpu.VMEM((TH + 2, W + 2, cmid_p), compute_dtype)],
        ),
        compiler_params=pltpu.CompilerParams(
            dimension_semantics=("parallel", "parallel"),
            vmem_limit_bytes=vmem_limit),
    )(tiles, w1_mat, t1_p, w2_mat, t2_p)

    out = out[..., :Cout]                       # drop lane padding
    return jnp.transpose(out, (0, 3, 1, 2))     # NHWC -> NCHW


def double_conv_reference(x, params, eps=1e-5):
    """Pure-JAX reference (NCHW) for checking the Pallas kernel."""
    (w1, b1, g1, be1, rm1, rv1,
     w2, b2, g2, be2, rm2, rv2) = params

    def conv_bn_relu(x, w, b, g, be, rm, rv):
        y = jax.lax.conv_general_dilated(
            x, w, window_strides=(1, 1), padding=((1, 1), (1, 1)),
            dimension_numbers=("NCHW", "OIHW", "NCHW"))
        y = y + b[None, :, None, None]
        y = (y - rm[None, :, None, None]) / jnp.sqrt(rv[None, :, None, None] + eps)
        y = y * g[None, :, None, None] + be[None, :, None, None]
        return jnp.maximum(y, 0.0)

    h = conv_bn_relu(x, w1, b1, g1, be1, rm1, rv1)
    return conv_bn_relu(h, w2, b2, g2, be2, rm2, rv2)


def make_params(key, in_channels, out_channels):
    ks = jax.random.split(key, 8)
    w1 = 0.1 * jax.random.normal(ks[0], (out_channels, in_channels, 3, 3), jnp.float32)
    b1 = 0.1 * jax.random.normal(ks[1], (out_channels,), jnp.float32)
    g1 = 1.0 + 0.1 * jax.random.normal(ks[2], (out_channels,), jnp.float32)
    be1 = 0.1 * jax.random.normal(ks[3], (out_channels,), jnp.float32)
    rm1 = 0.05 * jax.random.normal(ks[4], (out_channels,), jnp.float32)
    rv1 = 1.0 + 0.1 * jnp.abs(jax.random.normal(ks[5], (out_channels,), jnp.float32))

    w2 = 0.1 * jax.random.normal(ks[6], (out_channels, out_channels, 3, 3), jnp.float32)
    b2 = 0.1 * jax.random.normal(ks[7], (out_channels,), jnp.float32)
    g2 = jnp.linspace(0.9, 1.1, out_channels, dtype=jnp.float32)
    be2 = jnp.linspace(-0.05, 0.05, out_channels, dtype=jnp.float32)
    rm2 = jnp.linspace(-0.02, 0.02, out_channels, dtype=jnp.float32)
    rv2 = jnp.linspace(0.9, 1.2, out_channels, dtype=jnp.float32)
    return (w1, b1, g1, be1, rm1, rv1, w2, b2, g2, be2, rm2, rv2)


if __name__ == "__main__":
    key = jax.random.PRNGKey(0)
    k_x, k_p = jax.random.split(key)

    N, Cin, Cout, H, W = 2, 4, 8, 16, 16
    x = jax.random.normal(k_x, (N, Cin, H, W), jnp.float32)
    params = make_params(k_p, Cin, Cout)

    ref = double_conv_reference(x, params)

    # f32 path with forced 2-way spatial row tiling (exercises the halo logic).
    out_f32 = jax.block_until_ready(
        double_conv_pallas(x, params, compute_dtype=jnp.float32, tile_rows=8))
    assert out_f32.shape == (N, Cout, H, W), out_f32.shape
    assert jnp.allclose(out_f32, ref, atol=1e-4, rtol=1e-4), float(
        jnp.max(jnp.abs(out_f32 - ref)))

    # bf16 compute path (v6e/v7x), auto tile selection; f32 MXU accumulation.
    out_bf16 = jax.block_until_ready(
        double_conv_pallas(x, params, compute_dtype=jnp.bfloat16))
    assert out_bf16.shape == (N, Cout, H, W), out_bf16.shape
    assert jnp.allclose(out_bf16, ref, atol=1e-1, rtol=1e-1), float(
        jnp.max(jnp.abs(out_bf16 - ref)))

    print("KERNEL_OK")
</pallas_src>

<mosaic_0001>
module attributes {stable_mosaic.version = 11 : i64} {
  func.func @_double_conv_kernel(%arg0: i32, %arg1: i32, %arg2: memref<1x12x18x128xf32, #tpu.memory_space<vmem>>, %arg3: memref<1152x128xf32, #tpu.memory_space<vmem>>, %arg4: memref<1x128xf32, #tpu.memory_space<vmem>>, %arg5: memref<1152x128xf32, #tpu.memory_space<vmem>>, %arg6: memref<1x128xf32, #tpu.memory_space<vmem>>, %arg7: memref<1x8x16x128xf32, #tpu.memory_space<vmem>>, %arg8: memref<10x18x128xf32, #tpu.memory_space<vmem>>) attributes {dimension_semantics = [#tpu.dimension_semantics<parallel>, #tpu.dimension_semantics<parallel>], iteration_bounds = array<i64: 2, 2>, scalar_prefetch = 0 : i64, scratch_operands = 1 : i64, tpu.core_type = #tpu.core_type<tc>, window_params = [{transform_indices = @transform_0, window_bounds = array<i64: 1, 12, 18, 128>}, {pipeline_mode = #tpu.pipeline_mode<synchronous>, transform_indices = @transform_1, window_bounds = array<i64: 1152, 128>}, {pipeline_mode = #tpu.pipeline_mode<synchronous>, transform_indices = @transform_2, window_bounds = array<i64: 1, 128>}, {pipeline_mode = #tpu.pipeline_mode<synchronous>, transform_indices = @transform_3, window_bounds = array<i64: 1152, 128>}, {pipeline_mode = #tpu.pipeline_mode<synchronous>, transform_indices = @transform_4, window_bounds = array<i64: 1, 128>}, {transform_indices = @transform_5, window_bounds = array<i64: 1, 8, 16, 128>}]} {
    %c8_i32 = arith.constant 8 : i32
    %0 = arith.muli %arg1, %c8_i32 : i32
    %c0 = arith.constant 0 : index
    %c0_0 = arith.constant 0 : index
    %c0_1 = arith.constant 0 : index
    %c0_2 = arith.constant 0 : index
    %1 = vector.load %arg2[%c0, %c0_0, %c0_1, %c0_2] : memref<1x12x18x128xf32, #tpu.memory_space<vmem>>, vector<1x10x16x128xf32>
    %2 = vector.shape_cast %1 : vector<1x10x16x128xf32> to vector<10x16x128xf32>
    %c0_3 = arith.constant 0 : index
    %c0_4 = arith.constant 0 : index
    %c1 = arith.constant 1 : index
    %c0_5 = arith.constant 0 : index
    %3 = vector.load %arg2[%c0_3, %c0_4, %c1, %c0_5] : memref<1x12x18x128xf32, #tpu.memory_space<vmem>>, vector<1x10x16x128xf32>
    %4 = vector.shape_cast %3 : vector<1x10x16x128xf32> to vector<10x16x128xf32>
    %c0_6 = arith.constant 0 : index
    %c0_7 = arith.constant 0 : index
    %c2 = arith.constant 2 : index
    %c0_8 = arith.constant 0 : index
    %5 = vector.load %arg2[%c0_6, %c0_7, %c2, %c0_8] : memref<1x12x18x128xf32, #tpu.memory_space<vmem>>, vector<1x10x16x128xf32>
    %6 = vector.shape_cast %5 : vector<1x10x16x128xf32> to vector<10x16x128xf32>
    %c0_9 = arith.constant 0 : index
    %c1_10 = arith.constant 1 : index
    %c0_11 = arith.constant 0 : index
    %c0_12 = arith.constant 0 : index
    %7 = vector.load %arg2[%c0_9, %c1_10, %c0_11, %c0_12] : memref<1x12x18x128xf32, #tpu.memory_space<vmem>>, vector<1x10x16x128xf32>
    %8 = vector.shape_cast %7 : vector<1x10x16x128xf32> to vector<10x16x128xf32>
    %c0_13 = arith.constant 0 : index
    %c1_14 = arith.constant 1 : index
    %c1_15 = arith.constant 1 : index
    %c0_16 = arith.constant 0 : index
    %9 = vector.load %arg2[%c0_13, %c1_14, %c1_15, %c0_16] : memref<1x12x18x128xf32, #tpu.memory_space<vmem>>, vector<1x10x16x128xf32>
    %10 = vector.shape_cast %9 : vector<1x10x16x128xf32> to vector<10x16x128xf32>
    %c0_17 = arith.constant 0 : index
    %c1_18 = arith.constant 1 : index
    %c2_19 = arith.constant 2 : index
    %c0_20 = arith.constant 0 : index
    %11 = vector.load %arg2[%c0_17, %c1_18, %c2_19, %c0_20] : memref<1x12x18x128xf32, #tpu.memory_space<vmem>>, vector<1x10x16x128xf32>
    %12 = vector.shape_cast %11 : vector<1x10x16x128xf32> to vector<10x16x128xf32>
    %c0_21 = arith.constant 0 : index
    %c2_22 = arith.constant 2 : index
    %c0_23 = arith.constant 0 : index
    %c0_24 = arith.constant 0 : index
    %13 = vector.load %arg2[%c0_21, %c2_22, %c0_23, %c0_24] : memref<1x12x18x128xf32, #tpu.memory_space<vmem>>, vector<1x10x16x128xf32>
    %14 = vector.shape_cast %13 : vector<1x10x16x128xf32> to vector<10x16x128xf32>
    %c0_25 = arith.constant 0 : index
    %c2_26 = arith.constant 2 : index
    %c1_27 = arith.constant 1 : index
    %c0_28 = arith.constant 0 : index
    %15 = vector.load %arg2[%c0_25, %c2_26, %c1_27, %c0_28] : memref<1x12x18x128xf32, #tpu.memory_space<vmem>>, vector<1x10x16x128xf32>
    %16 = vector.shape_cast %15 : vector<1x10x16x128xf32> to vector<10x16x128xf32>
    %c0_29 = arith.constant 0 : index
    %c2_30 = arith.constant 2 : index
    %c2_31 = arith.constant 2 : index
    %c0_32 = arith.constant 0 : index
    %17 = vector.load %arg2[%c0_29, %c2_30, %c2_31, %c0_32] : memref<1x12x18x128xf32, #tpu.memory_space<vmem>>, vector<1x10x16x128xf32>
    %18 = vector.shape_cast %17 : vector<1x10x16x128xf32> to vector<10x16x128xf32>
    %19 = tpu.concatenate %2, %4, %6, %8, %10, %12, %14, %16, %18 in 2 : vector<10x16x128xf32>, vector<10x16x128xf32>, vector<10x16x128xf32>, vector<10x16x128xf32>, vector<10x16x128xf32>, vector<10x16x128xf32>, vector<10x16x128xf32>, vector<10x16x128xf32>, vector<10x16x128xf32> -> vector<10x16x1152xf32>
    %20 = vector.shape_cast %19 : vector<10x16x1152xf32> to vector<160x1152xf32>
    %c0_33 = arith.constant 0 : index
    %c0_34 = arith.constant 0 : index
    %21 = vector.load %arg3[%c0_33, %c0_34] : memref<1152x128xf32, #tpu.memory_space<vmem>>, vector<1152x128xf32>
    %cst = arith.constant dense<0.000000e+00> : vector<160x128xf32>
    %22 = tpu.matmul %20, %21, %cst {dimension_numbers = #tpu.dot_dimension_numbers<[1], [0], [0], [1], [0, 0, 1, 1], [], []>} : vector<160x1152xf32>, vector<1152x128xf32>, vector<160x128xf32> -> vector<160x128xf32>
    %c0_35 = arith.constant 0 : index
    %c0_36 = arith.constant 0 : index
    %23 = vector.load %arg4[%c0_35, %c0_36] : memref<1x128xf32, #tpu.memory_space<vmem>>, vector<1x128xf32>
    %24 = vector.broadcast %23 : vector<1x128xf32> to vector<160x128xf32>
    %25 = arith.addf %22, %24 : vector<160x128xf32>
    %cst_37 = arith.constant 0.000000e+00 : f32
    %26 = vector.broadcast %cst_37 : f32 to vector<160x128xf32>
    %27 = arith.maximumf %25, %26 : vector<160x128xf32>
    %28 = vector.shape_cast %27 : vector<160x128xf32> to vector<10x16x128xf32>
    %cst_38 = arith.constant 0.000000e+00 : f32
    %29 = vector.broadcast %cst_38 : f32 to vector<10x1x128xf32>
    %c0_39 = arith.constant 0 : index
    %c0_40 = arith.constant 0 : index
    %c0_41 = arith.constant 0 : index
    %30 = vector.load %arg8[%c0_39, %c0_40, %c0_41] : memref<10x18x128xf32, #tpu.memory_space<vmem>>, vector<10x1x128xf32>
    tpu.vector_store %arg8[%c0_39, %c0_40, %c0_41], %29 {strides = array<i32>} : memref<10x18x128xf32, #tpu.memory_space<vmem>>, vector<10x1x128xf32>,
    %cst_42 = arith.constant 0.000000e+00 : f32
    %31 = vector.broadcast %cst_42 : f32 to vector<10x1x128xf32>
    %c0_43 = arith.constant 0 : index
    %c17 = arith.constant 17 : index
    %c0_44 = arith.constant 0 : index
    %32 = vector.load %arg8[%c0_43, %c17, %c0_44] : memref<10x18x128xf32, #tpu.memory_space<vmem>>, vector<10x1x128xf32>
    tpu.vector_store %arg8[%c0_43, %c17, %c0_44], %31 {strides = array<i32>} : memref<10x18x128xf32, #tpu.memory_space<vmem>>, vector<10x1x128xf32>,
    %c0_45 = arith.constant 0 : index
    %c1_46 = arith.constant 1 : index
    %c0_47 = arith.constant 0 : index
    %33 = vector.load %arg8[%c0_45, %c1_46, %c0_47] : memref<10x18x128xf32, #tpu.memory_space<vmem>>, vector<10x16x128xf32>
    tpu.vector_store %arg8[%c0_45, %c1_46, %c0_47], %28 {strides = array<i32>} : memref<10x18x128xf32, #tpu.memory_space<vmem>>, vector<10x16x128xf32>,
    %c0_i32 = arith.constant 0 : i32
    %34 = arith.cmpi eq, %0, %c0_i32 : i32
    %35 = arith.extui %34 : i1 to i32
    %c0_i32_48 = arith.constant 0 : i32
    %36 = arith.cmpi ne, %35, %c0_i32_48 : i32
    scf.if %36 {
      %cst_88 = arith.constant 0.000000e+00 : f32
      %63 = vector.broadcast %cst_88 : f32 to vector<1x18x128xf32>
      %c0_89 = arith.constant 0 : index
      %c0_90 = arith.constant 0 : index
      %c0_91 = arith.constant 0 : index
      %64 = vector.load %arg8[%c0_89, %c0_90, %c0_91] : memref<10x18x128xf32, #tpu.memory_space<vmem>>, vector<1x18x128xf32>
      tpu.vector_store %arg8[%c0_89, %c0_90, %c0_91], %63 {strides = array<i32>} : memref<10x18x128xf32, #tpu.memory_space<vmem>>, vector<1x18x128xf32>,
    } else {
    }
    %c8_i32_49 = arith.constant 8 : i32
    %37 = arith.addi %0, %c8_i32_49 : i32
    %c16_i32 = arith.constant 16 : i32
    %38 = arith.cmpi eq, %37, %c16_i32 : i32
    %39 = arith.extui %38 : i1 to i32
    %c0_i32_50 = arith.constant 0 : i32
    %40 = arith.cmpi ne, %39, %c0_i32_50 : i32
    scf.if %40 {
      %cst_88 = arith.constant 0.000000e+00 : f32
      %63 = vector.broadcast %cst_88 : f32 to vector<1x18x128xf32>
      %c9 = arith.constant 9 : index
      %c0_89 = arith.constant 0 : index
      %c0_90 = arith.constant 0 : index
      %64 = vector.load %arg8[%c9, %c0_89, %c0_90] : memref<10x18x128xf32, #tpu.memory_space<vmem>>, vector<1x18x128xf32>
      tpu.vector_store %arg8[%c9, %c0_89, %c0_90], %63 {strides = array<i32>} : memref<10x18x128xf32, #tpu.memory_space<vmem>>, vector<1x18x128xf32>,
    } else {
    }
    %c0_51 = arith.constant 0 : index
    %c0_52 = arith.constant 0 : index
    %c0_53 = arith.constant 0 : index
    %41 = vector.load %arg8[%c0_51, %c0_52, %c0_53] : memref<10x18x128xf32, #tpu.memory_space<vmem>>, vector<8x16x128xf32>
    %c0_54 = arith.constant 0 : index
    %c1_55 = arith.constant 1 : index
    %c0_56 = arith.constant 0 : index
    %42 = vector.load %arg8[%c0_54, %c1_55, %c0_56] : memref<10x18x128xf32, #tpu.memory_space<vmem>>, vector<8x16x128xf32>
    %c0_57 = arith.constant 0 : index
    %c2_58 = arith.constant 2 : index
    %c0_59 = arith.constant 0 : index
    %43 = vector.load %arg8[%c0_57, %c2_58, %c0_59] : memref<10x18x128xf32, #tpu.memory_space<vmem>>, vector<8x16x128xf32>
    %c1_60 = arith.constant 1 : index
    %c0_61 = arith.constant 0 : index
    %c0_62 = arith.constant 0 : index
    %44 = vector.load %arg8[%c1_60, %c0_61, %c0_62] : memref<10x18x128xf32, #tpu.memory_space<vmem>>, vector<8x16x128xf32>
    %c1_63 = arith.constant 1 : index
    %c1_64 = arith.constant 1 : index
    %c0_65 = arith.constant 0 : index
    %45 = vector.load %arg8[%c1_63, %c1_64, %c0_65] : memref<10x18x128xf32, #tpu.memory_space<vmem>>, vector<8x16x128xf32>
    %c1_66 = arith.constant 1 : index
    %c2_67 = arith.constant 2 : index
    %c0_68 = arith.constant 0 : index
    %46 = vector.load %arg8[%c1_66, %c2_67, %c0_68] : memref<10x18x128xf32, #tpu.memory_space<vmem>>, vector<8x16x128xf32>
    %c2_69 = arith.constant 2 : index
    %c0_70 = arith.constant 0 : index
    %c0_71 = arith.constant 0 : index
    %47 = vector.load %arg8[%c2_69, %c0_70, %c0_71] : memref<10x18x128xf32, #tpu.memory_space<vmem>>, vector<8x16x128xf32>
    %c2_72 = arith.constant 2 : index
    %c1_73 = arith.constant 1 : index
    %c0_74 = arith.constant 0 : index
    %48 = vector.load %arg8[%c2_72, %c1_73, %c0_74] : memref<10x18x128xf32, #tpu.memory_space<vmem>>, vector<8x16x128xf32>
    %c2_75 = arith.constant 2 : index
    %c2_76 = arith.constant 2 : index
    %c0_77 = arith.constant 0 : index
    %49 = vector.load %arg8[%c2_75, %c2_76, %c0_77] : memref<10x18x128xf32, #tpu.memory_space<vmem>>, vector<8x16x128xf32>
    %50 = tpu.concatenate %41, %42, %43, %44, %45, %46, %47, %48, %49 in 2 : vector<8x16x128xf32>, vector<8x16x128xf32>, vector<8x16x128xf32>, vector<8x16x128xf32>, vector<8x16x128xf32>, vector<8x16x128xf32>, vector<8x16x128xf32>, vector<8x16x128xf32>, vector<8x16x128xf32> -> vector<8x16x1152xf32>
    %51 = vector.shape_cast %50 : vector<8x16x1152xf32> to vector<128x1152xf32>
    %c0_78 = arith.constant 0 : index
    %c0_79 = arith.constant 0 : index
    %52 = vector.load %arg5[%c0_78, %c0_79] : memref<1152x128xf32, #tpu.memory_space<vmem>>, vector<1152x128xf32>
    %cst_80 = arith.constant dense<0.000000e+00> : vector<128x128xf32>
    %53 = tpu.matmul %51, %52, %cst_80 {dimension_numbers = #tpu.dot_dimension_numbers<[1], [0], [0], [1], [0, 0, 1, 1], [], []>} : vector<128x1152xf32>, vector<1152x128xf32>, vector<128x128xf32> -> vector<128x128xf32>
    %c0_81 = arith.constant 0 : index
    %c0_82 = arith.constant 0 : index
    %54 = vector.load %arg6[%c0_81, %c0_82] : memref<1x128xf32, #tpu.memory_space<vmem>>, vector<1x128xf32>
    %55 = vector.broadcast %54 : vector<1x128xf32> to vector<128x128xf32>
    %56 = arith.addf %53, %55 : vector<128x128xf32>
    %cst_83 = arith.constant 0.000000e+00 : f32
    %57 = vector.broadcast %cst_83 : f32 to vector<128x128xf32>
    %58 = arith.maximumf %56, %57 : vector<128x128xf32>
    %59 = vector.shape_cast %58 : vector<128x128xf32> to vector<8x16x128xf32>
    %c0_84 = arith.constant 0 : index
    %c0_85 = arith.constant 0 : index
    %c0_86 = arith.constant 0 : index
    %c0_87 = arith.constant 0 : index
    %60 = vector.load %arg7[%c0_84, %c0_85, %c0_86, %c0_87] : memref<1x8x16x128xf32, #tpu.memory_space<vmem>>, vector<1x8x16x128xf32>
    %61 = vector.shape_cast %60 : vector<1x8x16x128xf32> to vector<8x16x128xf32>
    %62 = vector.shape_cast %59 : vector<8x16x128xf32> to vector<1x8x16x128xf32>
    tpu.vector_store %arg7[%c0_84, %c0_85, %c0_86, %c0_87], %62 {strides = array<i32>} : memref<1x8x16x128xf32, #tpu.memory_space<vmem>>, vector<1x8x16x128xf32>,
    return
  }
  func.func @transform_0(%arg0: i32, %arg1: i32) -> (i32, i32, i32, i32) {
    %c2_i32 = arith.constant 2 : i32
    %0 = arith.muli %arg0, %c2_i32 : i32
    %1 = arith.addi %0, %arg1 : i32
    %c0_i32 = arith.constant 0 : i32
    %c0_i32_0 = arith.constant 0 : i32
    %c0_i32_1 = arith.constant 0 : i32
    %c0_i32_2 = arith.constant 0 : i32
    return %1, %c0_i32, %c0_i32_0, %c0_i32_1 : i32, i32, i32, i32
  }
  func.func @transform_1(%arg0: i32, %arg1: i32) -> (i32, i32) {
    %c0_i32 = arith.constant 0 : i32
    %c0_i32_0 = arith.constant 0 : i32
    %c0_i32_1 = arith.constant 0 : i32
    return %c0_i32, %c0_i32_0 : i32, i32
  }
  func.func @transform_2(%arg0: i32, %arg1: i32) -> (i32, i32) {
    %c0_i32 = arith.constant 0 : i32
    %c0_i32_0 = arith.constant 0 : i32
    %c0_i32_1 = arith.constant 0 : i32
    return %c0_i32, %c0_i32_0 : i32, i32
  }
  func.func @transform_3(%arg0: i32, %arg1: i32) -> (i32, i32) {
    %c0_i32 = arith.constant 0 : i32
    %c0_i32_0 = arith.constant 0 : i32
    %c0_i32_1 = arith.constant 0 : i32
    return %c0_i32, %c0_i32_0 : i32, i32
  }
  func.func @transform_4(%arg0: i32, %arg1: i32) -> (i32, i32) {
    %c0_i32 = arith.constant 0 : i32
    %c0_i32_0 = arith.constant 0 : i32
    %c0_i32_1 = arith.constant 0 : i32
    return %c0_i32, %c0_i32_0 : i32, i32
  }
  func.func @transform_5(%arg0: i32, %arg1: i32) -> (i32, i32, i32, i32) {
    %c0_i32 = arith.constant 0 : i32
    %c0_i32_0 = arith.constant 0 : i32
    %c0_i32_1 = arith.constant 0 : i32
    return %arg0, %arg1, %c0_i32, %c0_i32_0 : i32, i32, i32, i32
  }
}

</mosaic_0001>

<bundles_post_ra>
// kernel: double_conv_pallas.1
= control target key start
LH: loop header
LB: loop body
LE: loop exit
PB: predicated region body
PF: predicated region fallthrough
CT: control target
= control target key end

     0   :  { %s3932_s18 = smov 0   ;;  %s3934_s19 = smov 0   ;;  %s5788_s0 = inlined_call_operand.vmem [shape: f32[4,12,18,128], index: 0, kind: input, shape index: {}]   ;;  %s5789_s1 = inlined_call_operand.vmem [shape: f32[1152,128], index: 1, kind: input, shape index: {}]   ;;  %s5790_s2 = inlined_call_operand.vmem [shape: f32[1,128], index: 2, kind: input, shape index: {}]   ;;  %s5791_s3 = inlined_call_operand.vmem [shape: f32[1152,128], index: 3, kind: input, shape index: {}]   ;;  %s5792_s4 = inlined_call_operand.vmem [shape: f32[1,128], index: 4, kind: input, shape index: {}]   ;;  %s5793_s5 = inlined_call_operand.vmem [shape: f32[2,16,16,128], index: 5, kind: output, shape index: {}]  }
   0x1   :  { %s3936_s20 = smov 0   ;;  %s3938_s21 = smov 0  }
   0x2   :  { %s3940_s22 = smov 0  }
   0x3 LB: > { %s24_s23 = sadd.s32 1, %s3888_s20  ;;  %s27_s24 = sadd.s32 1, %s3892_s21  ;;  %s3896_s22 = sphi %s3940_s22, %s15_s22   ;;  %s3892_s21 = sphi %s3938_s21, %s5797_s21   ;;  %s3888_s20 = sphi %s3936_s20, %s5796_s20   ;;  %s3884_s19 = sphi %s3934_s19, %s5795_s19   ;;  %s3880_s18 = sphi %s3932_s18, %s5794_s18  }
   0x4   : > { %p25_p0 = scmp.ge.s32.totalorder %s24_s23, 2  ;;  %p2649_p1 = scmp.ge.s32.totalorder %s3896_s22, 1 }
   0x5   : > { %p209_p2 = scmp.lt.s32.totalorder %s3896_s22, 5 }
   0x6   : > { %s5799_s23 = smov (%p25_p0, %s24_s23), 0  ;;  %s5801_s24 = smov (!%p25_p0, %s27_s24), %s3892_s21 }
   0x7   : > { %p210_p3 = pnand %p2649_p1, %p209_p2  ;;  %p29_p4 = scmp.ge.s32.totalorder %s5801_s24, 2 }
   0x8   : > { %s3967_s25 = sshll.u32 (!%p210_p3), %s3880_s18, 3  ;;  %p254_p5 = scmp.lt.s32.totalorder (!%p210_p3), %s3884_s19, 1  ;;  %v447_v0 = vld [vmem:[%s5789_s1] sm:$0xff] (!%p210_p3)  ;;  %v448_v1 = vld [vmem:[%s5789_s1 + $0x8] sm:$0xff] (!%p210_p3)  ;;  %v449_v2 = vld [vmem:[%s5789_s1 + $0x10] sm:$0xff] (!%p210_p3)  ;;  %v3898_v3 = vmov (!%p210_p3), 0.0|0.0  }
   0x9   : > { %s5803_s24 = smov (%p29_p4, %s5801_s24), 0  ;;  %213 = sbr.rel (%p210_p3) target bundleno = 1157 (0x485), region = 40 }
   0xa   : > { %p256_p6 = scmp.lt.s32.totalorder (!%p210_p3), %s3967_s25, 15  ;;  %3289 = vmatprep.subr.bf16.mxu0 (!%p210_p3), %v3898_v3  ;;  %v3290_v4 = vpack.c.bf16 (!%p210_p3), %v448_v1, %v447_v0  ;;  %v450_v5 = vld [vmem:[%s5789_s1 + $0x18] sm:$0xff] (!%p210_p3)  ;;  %s2650_s9 = sshll.u32 (!%p210_p3), %s3884_s19, 1  ;;  %v451_v7 = vld [vmem:[%s5789_s1 + $0x20] sm:$0xff] (!%p210_p3)  ;;  %v452_v8 = vld [vmem:[%s5789_s1 + $0x28] sm:$0xff] (!%p210_p3) }
   0xb   : > { %v3293_v6 = vpack.c.bf16 (!%p210_p3), %v450_v5, %v449_v2  ;;  %s245_s16 = sadd.s32 (!%p210_p3), %s3880_s18, %s2650_s9  ;;  %v3296_v9 = vpack.c.bf16 (!%p210_p3), %v452_v8, %v451_v7  ;;  %v453_v10 = vld [vmem:[%s5789_s1 + $0x30] sm:$0xff] (!%p210_p3)  ;;  %v454_v11 = vld [vmem:[%s5789_s1 + $0x38] sm:$0xff] (!%p210_p3)  ;;  %v455_v13 = vld [vmem:[%s5789_s1 + $0x40] sm:$0xff] (!%p210_p3)  ;;  %p2778_p8 = scmp.ne.s32.totalorder (!%p210_p3), %s3967_s25, 0 }
   0xc   : > { %3291 = vmatpush1.bf16.msra.mxu0 (!%p210_p3), %v3290_v4  ;;  %p246_p7 = scmp.lt.s32.totalorder (!%p210_p3), %s245_s16, 3  ;;  %v3299_v12 = vpack.c.bf16 (!%p210_p3), %v454_v11, %v453_v10  ;;  %v456_v14 = vld [vmem:[%s5789_s1 + $0x48] sm:$0xff] (!%p210_p3)  ;;  %v457_v17 = vld [vmem:[%s5789_s1 + $0x50] sm:$0xff] (!%p210_p3)  ;;  %v458_v18 = vld [vmem:[%s5789_s1 + $0x58] sm:$0xff] (!%p210_p3) }
   0xd   : > { %3292 = vmatprep.subr.bf16.mxu0 (!%p210_p3), %v3898_v3  ;;  %v3302_v16 = vpack.c.bf16 (!%p210_p3), %v456_v14, %v455_v13  ;;  %v3305_v19 = vpack.c.bf16 (!%p210_p3), %v458_v18, %v457_v17  ;;  %v459_v20 = vld [vmem:[%s5789_s1 + $0x60] sm:$0xff] (!%p210_p3)  ;;  %v460_v21 = vld [vmem:[%s5789_s1 + $0x68] sm:$0xff] (!%p210_p3)  ;;  %v461_v23 = vld [vmem:[%s5789_s1 + $0x70] sm:$0xff] (!%p210_p3) }
   0xe   : > { %v3308_v22 = vpack.c.bf16 (!%p210_p3), %v460_v21, %v459_v20  ;;  %v462_v24 = vld [vmem:[%s5789_s1 + $0x78] sm:$0xff] (!%p210_p3)  ;;  %v463_v26 = vld [vmem:[%s5789_s1 + $0x80] sm:$0xff] (!%p210_p3)  ;;  %v464_v27 = vld [vmem:[%s5789_s1 + $0x88] sm:$0xff] (!%p210_p3) }
   0xf   : > { %v3311_v25 = vpack.c.bf16 (!%p210_p3), %v462_v24, %v461_v23  ;;  %v3314_v28 = vpack.c.bf16 (!%p210_p3), %v464_v27, %v463_v26  ;;  %v465_v29 = vld [vmem:[%s5789_s1 + $0x90] sm:$0xff] (!%p210_p3)  ;;  %v466_v30 = vld [vmem:[%s5789_s1 + $0x98] sm:$0xff] (!%p210_p3)  ;;  %v467_v32 = vld [vmem:[%s5789_s1 + $0xa0] sm:$0xff] (!%p210_p3) }
  0x10   : > { %s5805_s19 = smov (!%p254_p5, %s3884_s19), 1  ;;  %3294 = vmatpush1.bf16.msra.mxu0 %v3293_v6  ;;  %s5807_s16 = smov (!%p246_p7, %s245_s16), 3  ;;  %v3317_v31 = vpack.c.bf16 %v466_v30, %v465_v29  ;;  %v468_v33 = vld [vmem:[%s5789_s1 + $0xa8] sm:$0xff]  ;;  %v469_v36 = vld [vmem:[%s5789_s1 + $0xb0] sm:$0xff]  ;;  %v470_v37 = vld [vmem:[%s5789_s1 + $0xb8] sm:$0xff] }
  0x11   : > { %s257_s10 = scalar_select %p256_p6, %s3967_s25, 15  ;;  %3295 = vmatprep.subr.bf16.mxu0 %v3898_v3  ;;  %v3320_v35 = vpack.c.bf16 %v468_v33, %v467_v32  ;;  %v3323_v38 = vpack.c.bf16 %v470_v37, %v469_v36  ;;  %v471_v39 = vld [vmem:[%s5789_s1 + $0xc0] sm:$0xff]  ;;  %v472_v40 = vld [vmem:[%s5789_s1 + $0xc8] sm:$0xff]  ;;  %v473_v42 = vld [vmem:[%s5789_s1 + $0xd0] sm:$0xff] }
  0x12   : > { %s2654_s11 = sshll.u32 %s5805_s19, 5  ;;  %s3813_s18 = smul.u32 288, %s5807_s16  ;;  %v3326_v41 = vpack.c.bf16 %v472_v40, %v471_v39  ;;  %v474_v43 = vld [vmem:[%s5789_s1 + $0xd8] sm:$0xff]  ;;  %v475_v45 = vld [vmem:[%s5789_s1 + $0xe0] sm:$0xff]  ;;  %v476_v46 = vld [vmem:[%s5789_s1 + $0xe8] sm:$0xff] }
  0x13   : > { %s2653_s17 = sshll.u32 %s257_s10, 1  ;;  %v3329_v44 = vpack.c.bf16 %v474_v43, %v473_v42  ;;  %v3332_v47 = vpack.c.bf16 %v476_v46, %v475_v45  ;;  %v477_v48 = vld [vmem:[%s5789_s1 + $0xf0] sm:$0xff]  ;;  %v478_v49 = vld [vmem:[%s5789_s1 + $0xf8] sm:$0xff]  ;;  %v479_v51 = vld [vmem:[%s5789_s1 + $0x100] sm:$0xff] }
  0x14   : > { %s260_s26 = sadd.s32 %s2654_s11, %s2653_s17  ;;  %3297 = vmatpush1.bf16.msra.mxu0 %v3296_v9  ;;  %s4017_s15 = scalar_lea.vmem %s5788_s0, %s3813_s18  ;;  %v3335_v50 = vpack.c.bf16 %v478_v49, %v477_v48  ;;  %v480_v52 = vld [vmem:[%s5789_s1 + $0x108] sm:$0xff]  ;;  %v481_v56 = vld [vmem:[%s5789_s1 + $0x110] sm:$0xff]  ;;  %v482_v57 = vld [vmem:[%s5789_s1 + $0x118] sm:$0xff] }
  0x15   : > { %s2655_s27 = sshll.u32 %s260_s26, 3  ;;  %3298 = vmatprep.subr.bf16.mxu0 %v3898_v3  ;;  %v285_v15 = vld [vmem:[%s4017_s15 + $0x1] sm:$0xff]  ;;  %v4063_v34 = vld [vmem:[%s4017_s15 + $0x32] sm:$0xff]  ;;  %v3338_v54 = vpack.c.bf16 %v480_v52, %v479_v51  ;;  %v286_v55 = vld [vmem:[%s4017_s15 + $0x9] sm:$0xff]  ;;  %v3341_v59 = vpack.c.bf16 %v482_v57, %v481_v56 }
  0x16   : > { %s3998_s19 = scalar_lea.vmem %s5793_s5, %s2655_s27  ;;  %662 = vmatprep.mubr.f32.mxu0 %v285_v15  ;;  %3203 = vmatprep.mubr.f32.mxu1 %v4063_v34  ;;  %v265_v53 = vld [vmem:[%s4017_s15] sm:$0xff]  ;;  %v266_v58 = vld [vmem:[%s4017_s15 + $0x8] sm:$0xff]  ;;  %v4130_v63 = vld [vmem:[%s4017_s15 + $0x18] sm:$0xff] }
  0x17   : > { %v4120_v60 = vld [vmem:[%s4017_s15 + $0x19] sm:$0xff]  ;;  %v484_v62 = vld [vmem:[%s5789_s1 + $0x128] sm:$0xff]  ;;  %v485_v2 = vld [vmem:[%s5789_s1 + $0x130] sm:$0xff] }
  0x18   : > { %3300 = vmatpush1.bf16.msra.mxu0 %v3299_v12  ;;  %v483_v61 = vld [vmem:[%s5789_s1 + $0x120] sm:$0xff]  ;;  %v486_v4 = vld [vmem:[%s5789_s1 + $0x138] sm:$0xff]  ;;  %v488_v9 = vld [vmem:[%s5789_s1 + $0x148] sm:$0xff] }
  0x19   : > { %3301 = vmatprep.subr.bf16.mxu0 %v3898_v3  ;;  %v3344_v0 = vpack.c.bf16 %v484_v62, %v483_v61  ;;  %v4134_v1 = vld [vmem:[%s4017_s15 + $0x21] sm:$0xff]  ;;  %v3347_v6 = vpack.c.bf16 %v486_v4, %v485_v2  ;;  %v4148_v7 = vld [vmem:[%s4017_s15 + $0x31] sm:$0xff]  ;;  %v4163_v12 = vld [vmem:[%s4017_s15 + $0x39] sm:$0xff] }
  0x1a   : > { %v4145_v5 = vld [vmem:[%s4017_s15 + $0x20] sm:$0xff]  ;;  %v4160_v10 = vld [vmem:[%s4017_s15 + $0x30] sm:$0xff]  ;;  %v490_v14 = vld [vmem:[%s5789_s1 + $0x158] sm:$0xff] }
  0x1b   : > { %v487_v8 = vld [vmem:[%s5789_s1 + $0x140] sm:$0xff]  ;;  %v489_v13 = vld [vmem:[%s5789_s1 + $0x150] sm:$0xff]  ;;  %v4175_v15 = vld [vmem:[%s4017_s15 + $0x38] sm:$0xff] }
  0x1c   : > { %3303 = vmatpush1.bf16.msra.mxu0 %v3302_v16  ;;  %v3350_v11 = vpack.c.bf16 %v488_v9, %v487_v8  ;;  %v3353_v16 = vpack.c.bf16 %v490_v14, %v489_v13  ;;  %v4178_v17 = vld [vmem:[%s4017_s15 + $0x49] sm:$0xff]  ;;  %v491_v18 = vld [vmem:[%s5789_s1 + $0x160] sm:$0xff]  ;;  %v494_v24 = vld [vmem:[%s5789_s1 + $0x178] sm:$0xff] }
  0x1d   : > { %3304 = vmatprep.subr.bf16.mxu0 %v3898_v3  ;;  %v4190_v20 = vld [vmem:[%s4017_s15 + $0x48] sm:$0xff]  ;;  %v493_v23 = vld [vmem:[%s5789_s1 + $0x170] sm:$0xff]  ;;  %v4220_v30 = vld [vmem:[%s4017_s15 + $0x60] sm:$0xff] }
  0x1e   : > { %v3359_v26 = vpack.c.bf16 %v494_v24, %v493_v23  ;;  %v4208_v27 = vld [vmem:[%s4017_s15 + $0x61] sm:$0xff]  ;;  %v4223_v32 = vld [vmem:[%s4017_s15 + $0x69] sm:$0xff]  ;;  %v502_v45 = vld [vmem:[%s5789_s1 + $0x1b8] sm:$0xff] }
  0x1f   : > { %v496_v29 = vld [vmem:[%s5789_s1 + $0x188] sm:$0xff]  ;;  %v497_v33 = vld [vmem:[%s5789_s1 + $0x190] sm:$0xff]  ;;  %v499_v39 = vld [vmem:[%s5789_s1 + $0x1a0] sm:$0xff] }
  0x20   : > { %3306 = vmatpush1.bf16.msra.mxu0 %v3305_v19  ;;  %v492_v19 = vld [vmem:[%s5789_s1 + $0x168] sm:$0xff]  ;;  %v4265_v46 = vld [vmem:[%s4017_s15 + $0x80] sm:$0xff]  ;;  %v4268_v48 = vld [vmem:[%s4017_s15 + $0x91] sm:$0xff] }
  0x21   : > { %3307 = vmatprep.subr.bf16.mxu0 %v3898_v3  ;;  %v3356_v21 = vpack.c.bf16 %v492_v19, %v491_v18  ;;  %v4235_v36 = vld [vmem:[%s4017_s15 + $0x68] sm:$0xff]  ;;  %v503_v49 = vld [vmem:[%s5789_s1 + $0x1c0] sm:$0xff]  ;;  %v4280_v51 = vld [vmem:[%s4017_s15 + $0x90] sm:$0xff] }
  0x22   : > { %v500_v40 = vld [vmem:[%s5789_s1 + $0x1a8] sm:$0xff]  ;;  %v4295_v56 = vld [vmem:[%s4017_s15 + $0x98] sm:$0xff]  ;;  %v509_v4 = vld [vmem:[%s5789_s1 + $0x1f0] sm:$0xff] }
  0x23   : > { %v3368_v42 = vpack.c.bf16 %v500_v40, %v499_v39  ;;  %v4253_v43 = vld [vmem:[%s4017_s15 + $0x81] sm:$0xff]  ;;  %v4313_v2 = vld [vmem:[%s4017_s15 + $0xb1] sm:$0xff]  ;;  %v4337_v14 = vld [vmem:[%s4017_s15 + $0xc9] sm:$0xff] }
  0x24   : > { %3309 = vmatpush1.bf16.msra.mxu0 %v3308_v22  ;;  %v4193_v22 = vld [vmem:[%s4017_s15 + $0x51] sm:$0xff]  ;;  %v508_v61 = vld [vmem:[%s5789_s1 + $0x1e8] sm:$0xff]  ;;  %v4334_v13 = vld [vmem:[%s4017_s15 + $0xc0] sm:$0xff] }
  0x25   : > { %3310 = vmatprep.subr.bf16.mxu0 %v3898_v3  ;;  %v4310_v62 = vld [vmem:[%s4017_s15 + $0xa8] sm:$0xff]  ;;  %v4325_v8 = vld [vmem:[%s4017_s15 + $0xb0] sm:$0xff]  ;;  %v4346_v18 = vld [vmem:[%s4017_s15 + $0xd9] sm:$0xff] }
  0x26   : > { %v4351_v19 = vld [vmem:[%s4017_s15 + $0xd8] sm:$0xff]  ;;  %v4359_v23 = vld [vmem:[%s4017_s15 + $0xe0] sm:$0xff] }
  0x27   : > { %v511_v24 = vld [vmem:[%s5789_s1 + $0x200] sm:$0xff] }
  0x28   : > { %3312 = vmatpush1.bf16.msra.mxu0 %v3311_v25  ;;  %v4205_v25 = vld [vmem:[%s4017_s15 + $0x50] sm:$0xff] }
  0x29   : > { %3313 = vmatprep.subr.bf16.mxu0 %v3898_v3 }
  0x2c   : > { %3315 = vmatpush1.bf16.msra.mxu0 %v3314_v28  ;;  %v495_v28 = vld [vmem:[%s5789_s1 + $0x180] sm:$0xff] }
  0x2d   : > { %3316 = vmatprep.subr.bf16.mxu0 %v3898_v3 }
  0x30   : > { %3318 = vmatpush1.bf16.msra.mxu0 %v3317_v31  ;;  %v3362_v31 = vpack.c.bf16 %v496_v29, %v495_v28  ;;  %v305_v28 = vld [vmem:[%s4017_s15 + $0x2] sm:$0xff] }
  0x31   : > { %3319 = vmatprep.subr.bf16.mxu0 %v3898_v3 }
  0x34   : > { %3321 = vmatpush1.bf16.msra.mxu0 %v3320_v35  ;;  %v498_v35 = vld [vmem:[%s5789_s1 + $0x198] sm:$0xff] }
  0x35   : > { %3322 = vmatprep.subr.bf16.mxu0 %v3898_v3  ;;  %v3365_v37 = vpack.c.bf16 %v498_v35, %v497_v33  ;;  %v514_v33 = vld [vmem:[%s5789_s1 + $0x218] sm:$0xff]  ;;  %v575_v35 = vld [vmem:[%s5789_s1 + $0x400] sm:$0xff] }
  0x38   : > { %3324 = vmatpush1.bf16.msra.mxu0 %v3323_v38  ;;  %v4238_v38 = vld [vmem:[%s4017_s15 + $0x79] sm:$0xff] }
  0x39   : > { %3325 = vmatprep.subr.bf16.mxu0 %v3898_v3 }
  0x3c   : > { %3327 = vmatpush1.bf16.msra.mxu0 %v3326_v41  ;;  %v4250_v41 = vld [vmem:[%s4017_s15 + $0x78] sm:$0xff] }
  0x3d   : > { %3328 = vmatprep.subr.bf16.mxu0 %v3898_v3 }
  0x40   : > { %3330 = vmatpush1.bf16.msra.mxu0 %v3329_v44  ;;  %v501_v44 = vld [vmem:[%s5789_s1 + $0x1b0] sm:$0xff] }
  0x41   : > { %3331 = vmatprep.subr.bf16.mxu0 %v3898_v3 }
  0x44   : > { %3333 = vmatpush1.bf16.msra.mxu0 %v3332_v47  ;;  %v3371_v47 = vpack.c.bf16 %v502_v45, %v501_v44  ;;  %v516_v44 = vld [vmem:[%s5789_s1 + $0x228] sm:$0xff]  ;;  %v577_v45 = vld [vmem:[%s5789_s1 + $0x410] sm:$0xff] }
  0x45   : > { %3334 = vmatprep.subr.bf16.mxu0 %v3898_v3 }
  0x48   : > { %3336 = vmatpush1.bf16.msra.mxu0 %v3335_v50  ;;  %v504_v50 = vld [vmem:[%s5789_s1 + $0x1c8] sm:$0xff] }
  0x49   : > { %3337 = vmatprep.subr.bf16.mxu0 %v3898_v3  ;;  %v3374_v52 = vpack.c.bf16 %v504_v50, %v503_v49  ;;  %v4399_v49 = vld [vmem:[%s4017_s15 + $0x1a] sm:$0xff] }
  0x4b   : > { %663 = vmatmul.mubr.f32.vlgmr.msra.gmra.mrb[0].mxu0 %v265_v53  ;;  %v4283_v53 = vld [vmem:[%s4017_s15 + $0x99] sm:$0xff] }
  0x4c   : > { %3339 = vmatpush1.bf16.msra.mxu0 %v3338_v54  ;;  %667 = vmatprep.mubr.f32.mxu0 %v286_v55  ;;  %v505_v54 = vld [vmem:[%s5789_s1 + $0x1d0] sm:$0xff]  ;;  %v506_v55 = vld [vmem:[%s5789_s1 + $0x1d8] sm:$0xff] }
  0x4d   : > { %3340 = vmatprep.subr.bf16.mxu0 %v3898_v3  ;;  %v3377_v57 = vpack.c.bf16 %v506_v55, %v505_v54  ;;  %v518_v54 = vld [vmem:[%s5789_s1 + $0x238] sm:$0xff]  ;;  %v579_v55 = vld [vmem:[%s5789_s1 + $0x420] sm:$0xff] }
  0x4f   : > { %668 = vmatmul.mubr.f32.gmra.mrb[2].mxu0 %v266_v58  ;;  %v4298_v58 = vld [vmem:[%s4017_s15 + $0xa9] sm:$0xff] }
  0x50   : > { %3342 = vmatpush1.bf16.msra.mxu0 %v3341_v59  ;;  %672 = vmatprep.mubr.f32.mxu0 %v4120_v60  ;;  %v507_v59 = vld [vmem:[%s5789_s1 + $0x1e0] sm:$0xff] }
  0x51   : > { %3343 = vmatprep.subr.bf16.mxu0 %v3898_v3 }
  0x53   : > { %673 = vmatmul.mubr.f32.gmra.mrb[4].mxu0 %v4130_v63 }
  0x54   : > { %677 = vmatprep.mubr.f32.mxu0 %v4134_v1  ;;  %3345 = vmatpush1.bf16.msra.mxu0 %v3344_v0  ;;  %v3380_v0 = vpack.c.bf16 %v508_v61, %v507_v59  ;;  %v4417_v61 = vld [vmem:[%s4017_s15 + $0x22] sm:$0xff] }
  0x55   : > { %3346 = vmatprep.subr.bf16.mxu0 %v3898_v3 }
  0x57   : > { %678 = vmatmul.mubr.f32.gmra.mrb[6].mxu0 %v4145_v5 }
  0x58   : > { %682 = vmatprep.mubr.f32.mxu0 %v4148_v7  ;;  %3348 = vmatpush1.bf16.msra.mxu0 %v3347_v6  ;;  %v510_v6 = vld [vmem:[%s5789_s1 + $0x1f8] sm:$0xff] }
  0x59   : > { %3349 = vmatprep.subr.bf16.mxu0 %v3898_v3  ;;  %v3383_v9 = vpack.c.bf16 %v510_v6, %v509_v4  ;;  %v519_v4 = vld [vmem:[%s5789_s1 + $0x240] sm:$0xff]  ;;  %v520_v6 = vld [vmem:[%s5789_s1 + $0x248] sm:$0xff] }
  0x5b   : > { %683 = vmatmul.mubr.f32.gmra.mrb[8].mxu0 %v4160_v10 }
  0x5c   : > { %687 = vmatprep.mubr.f32.mxu0 %v4163_v12  ;;  %3351 = vmatpush1.bf16.msra.mxu0 %v3350_v11  ;;  %v4328_v11 = vld [vmem:[%s4017_s15 + $0xc1] sm:$0xff] }
  0x5d   : > { %3352 = vmatprep.subr.bf16.mxu0 %v3898_v3 }
  0x5f   : > { %688 = vmatmul.mubr.f32.gmra.mrb[10].mxu0 %v4175_v15 }
  0x60   : > { %692 = vmatprep.mubr.f32.mxu0 %v4178_v17  ;;  %3354 = vmatpush1.bf16.msra.mxu0 %v3353_v16  ;;  %v4343_v16 = vld [vmem:[%s4017_s15 + $0xc8] sm:$0xff] }
  0x61   : > { %3355 = vmatprep.subr.bf16.mxu0 %v3898_v3 }
  0x63   : > { %693 = vmatmul.mubr.f32.gmra.mrb[12].mxu0 %v4190_v20 }
  0x64   : > { %697 = vmatprep.mubr.f32.mxu0 %v4193_v22  ;;  %3357 = vmatpush1.bf16.msra.mxu0 %v3356_v21  ;;  %v4354_v21 = vld [vmem:[%s4017_s15 + $0xe1] sm:$0xff] }
  0x65   : > { %3358 = vmatprep.subr.bf16.mxu0 %v3898_v3 }
  0x67   : > { %698 = vmatmul.mubr.f32.gmra.mrb[14].mxu0 %v4205_v25 }
  0x68   : > { %702 = vmatprep.mubr.f32.mxu0 %v4208_v27  ;;  %3360 = vmatpush1.bf16.msra.mxu0 %v3359_v26  ;;  %v512_v26 = vld [vmem:[%s5789_s1 + $0x208] sm:$0xff] }
  0x69   : > { %3361 = vmatprep.subr.bf16.mxu0 %v3898_v3  ;;  %v3386_v29 = vpack.c.bf16 %v512_v26, %v511_v24  ;;  %v582_v24 = vld [vmem:[%s5789_s1 + $0x438] sm:$0xff] }
  0x6b   : > { %703 = vmatmul.mubr.f32.gmra.mrb[16].mxu0 %v4220_v30 }
  0x6c   : > { %707 = vmatprep.mubr.f32.mxu0 %v4223_v32  ;;  %3363 = vmatpush1.bf16.msra.mxu0 %v3362_v31  ;;  %v513_v31 = vld [vmem:[%s5789_s1 + $0x210] sm:$0xff] }
  0x6d   : > { %3364 = vmatprep.subr.bf16.mxu0 %v3898_v3  ;;  %v3389_v40 = vpack.c.bf16 %v514_v33, %v513_v31  ;;  %v522_v31 = vld [vmem:[%s5789_s1 + $0x258] sm:$0xff]  ;;  %v583_v33 = vld [vmem:[%s5789_s1 + $0x440] sm:$0xff] }
  0x6f   : > { %708 = vmatmul.mubr.f32.gmra.mrb[18].mxu0 %v4235_v36 }
  0x70   : > { %712 = vmatprep.mubr.f32.mxu0 %v4238_v38  ;;  %3366 = vmatpush1.bf16.msra.mxu0 %v3365_v37  ;;  %v576_v37 = vld [vmem:[%s5789_s1 + $0x408] sm:$0xff] }
  0x71   : > { %3367 = vmatprep.subr.bf16.mxu0 %v3898_v3  ;;  %v3481_v39 = vpack.c.bf16 %v576_v37, %v575_v35  ;;  %v584_v35 = vld [vmem:[%s5789_s1 + $0x448] sm:$0xff] }
  0x72   : > { %v3497_v37 = vpack.c.bf16 %v584_v35, %v583_v33  ;;  %v529_v33 = vld [vmem:[%s5789_s1 + $0x290] sm:$0xff]  ;;  %v530_v35 = vld [vmem:[%s5789_s1 + $0x298] sm:$0xff] }
  0x73   : > { %713 = vmatmul.mubr.f32.gmra.mrb[20].mxu0 %v4250_v41  ;;  %3482 = vmatprep.subr.bf16.mxu1 %v3481_v39 }
  0x74   : > { %717 = vmatprep.mubr.f32.mxu0 %v4253_v43  ;;  %3369 = vmatpush1.bf16.msra.mxu0 %v3368_v42  ;;  %v515_v42 = vld [vmem:[%s5789_s1 + $0x220] sm:$0xff] }
  0x75   : > { %3370 = vmatprep.subr.bf16.mxu0 %v3898_v3  ;;  %3484 = vmatpush3.bf16.msra.mxu1 %v3481_v39  ;;  %v3392_v50 = vpack.c.bf16 %v516_v44, %v515_v42  ;;  %v4450_v39 = vld [vmem:[%s4017_s15 + $0x3a] sm:$0xff]  ;;  %v524_v42 = vld [vmem:[%s5789_s1 + $0x268] sm:$0xff]  ;;  %v585_v44 = vld [vmem:[%s5789_s1 + $0x450] sm:$0xff] }
  0x77   : > { %718 = vmatmul.mubr.f32.gmra.mrb[22].mxu0 %v4265_v46 }
  0x78   : > { %722 = vmatprep.mubr.f32.mxu0 %v4268_v48  ;;  %3372 = vmatpush1.bf16.msra.mxu0 %v3371_v47 }
  0x79   : > { %3373 = vmatprep.subr.bf16.mxu0 %v3898_v3 }
  0x7b   : > { %723 = vmatmul.mubr.f32.gmra.mrb[24].mxu0 %v4280_v51 }
  0x7c   : > { %727 = vmatprep.mubr.f32.mxu0 %v4283_v53  ;;  %3375 = vmatpush1.bf16.msra.mxu0 %v3374_v52  ;;  %v517_v52 = vld [vmem:[%s5789_s1 + $0x230] sm:$0xff] }
  0x7d   : > { %3376 = vmatprep.subr.bf16.mxu0 %v3898_v3 }
  0x7f   : > { %728 = vmatmul.mubr.f32.gmra.mrb[26].mxu0 %v4295_v56 }
  0x80   : > { %732 = vmatprep.mubr.f32.mxu0 %v4298_v58  ;;  %3378 = vmatpush1.bf16.msra.mxu0 %v3377_v57  ;;  %v580_v57 = vld [vmem:[%s5789_s1 + $0x428] sm:$0xff] }
  0x81   : > { %3379 = vmatprep.subr.bf16.mxu0 %v3898_v3  ;;  %v3489_v59 = vpack.c.bf16 %v580_v57, %v579_v55  ;;  %v587_v55 = vld [vmem:[%s5789_s1 + $0x460] sm:$0xff]  ;;  %v588_v57 = vld [vmem:[%s5789_s1 + $0x468] sm:$0xff] }
  0x83   : > { %733 = vmatmul.mubr.f32.gmra.mrb[28].mxu0 %v4310_v62 }
  0x84   : > { %737 = vmatprep.mubr.f32.mxu0 %v4313_v2  ;;  %3381 = vmatpush1.bf16.msra.mxu0 %v3380_v0  ;;  %v3395_v0 = vpack.c.bf16 %v518_v54, %v517_v52  ;;  %v525_v52 = vld [vmem:[%s5789_s1 + $0x270] sm:$0xff]  ;;  %v526_v54 = vld [vmem:[%s5789_s1 + $0x278] sm:$0xff] }
  0x85   : > { %3382 = vmatprep.subr.bf16.mxu0 %v3898_v3 }
  0x87   : > { %738 = vmatmul.mubr.f32.gmra.mrb[30].mxu0 %v4325_v8 }
  0x88   : > { %742 = vmatprep.mubr.f32.mxu0 %v4328_v11  ;;  %3384 = vmatpush1.bf16.msra.mxu0 %v3383_v9  ;;  %v581_v9 = vld [vmem:[%s5789_s1 + $0x430] sm:$0xff] }
  0x89   : > { %3385 = vmatprep.subr.bf16.mxu0 %v3898_v3  ;;  %v3493_v26 = vpack.c.bf16 %v582_v24, %v581_v9  ;;  %v528_v9 = vld [vmem:[%s5789_s1 + $0x288] sm:$0xff]  ;;  %v589_v24 = vld [vmem:[%s5789_s1 + $0x470] sm:$0xff] }
  0x8b   : > { %743 = vmatmul.mubr.f32.gmra.mrb[32].mxu0 %v4334_v13 }
  0x8c   : > { %747 = vmatprep.mubr.f32.mxu0 %v4337_v14 }
  0x8f   : > { %748 = vmatmul.mubr.f32.gmra.mrb[34].mxu0 %v4343_v16 }
  0x90   : > { %752 = vmatprep.mubr.f32.mxu0 %v4346_v18 }
  0x93   : > { %753 = vmatmul.mubr.f32.gmra.mrb[36].mxu0 %v4351_v19 }
  0x94   : > { %757 = vmatprep.mubr.f32.mxu0 %v4354_v21 }
  0x97   : > { %758 = vmatmul.mubr.f32.gmra.mrb[38].mxu0 %v4359_v23 }
  0x98   : > { %827 = vmatprep.mubr.f32.mxu0 %v4130_v63  ;;  %v306_v63 = vld [vmem:[%s4017_s15 + $0xa] sm:$0xff] }
  0x9b   : > { %828 = vmatmul.mubr.f32.vlgmr.msra.gmra.mrb[0].mxu0 %v305_v28  ;;  %v3398_v28 = vpack.c.bf16 %v520_v6, %v519_v4  ;;  %v3407_v4 = vpack.c.bf16 %v526_v54, %v525_v52  ;;  %v527_v6 = vld [vmem:[%s5789_s1 + $0x280] sm:$0xff] }
  0x9c   : > { %3387 = vmatpush1.bf16.msra.mxu0 %v3386_v29  ;;  %832 = vmatprep.mubr.f32.mxu0 %v4145_v5  ;;  %v578_v5 = vld [vmem:[%s5789_s1 + $0x418] sm:$0xff]  ;;  %v521_v29 = vld [vmem:[%s5789_s1 + $0x250] sm:$0xff]  ;;  %v4544_v52 = vld [vmem:[%s4017_s15 + $0x82] sm:$0xff] }
  0x9d   : > { %3388 = vmatprep.subr.bf16.mxu0 %v3898_v3  ;;  %v3485_v47 = vpack.c.bf16 %v578_v5, %v577_v45  ;;  %v586_v45 = vld [vmem:[%s5789_s1 + $0x458] sm:$0xff] }
  0x9e   : > { %v3501_v5 = vpack.c.bf16 %v586_v45, %v585_v44  ;;  %v4530_v44 = vld [vmem:[%s4017_s15 + $0x7a] sm:$0xff] }
  0x9f   : > { %833 = vmatmul.mubr.f32.gmra.mrb[2].mxu0 %v306_v63  ;;  %3486 = vmatprep.subr.bf16.mxu1 %v3485_v47  ;;  %v3401_v63 = vpack.c.bf16 %v522_v31, %v521_v29  ;;  %v4504_v29 = vld [vmem:[%s4017_s15 + $0x62] sm:$0xff]  ;;  %v3410_v31 = vpack.c.bf16 %v528_v9, %v527_v6  ;;  %v537_v6 = vld [vmem:[%s5789_s1 + $0x2d0] sm:$0xff]  ;;  %v538_v9 = vld [vmem:[%s5789_s1 + $0x2d8] sm:$0xff] }
  0xa0   : > { %3390 = vmatpush1.bf16.msra.mxu0 %v3389_v40  ;;  %837 = vmatprep.mubr.f32.mxu0 %v4160_v10  ;;  %v523_v40 = vld [vmem:[%s5789_s1 + $0x260] sm:$0xff] }
  0xa1   : > { %3391 = vmatprep.subr.bf16.mxu0 %v3898_v3  ;;  %3488 = vmatpush3.bf16.msra.mxu1 %v3485_v47  ;;  %v4468_v47 = vld [vmem:[%s4017_s15 + $0x4a] sm:$0xff] }
  0xa2   : > { %3490 = vmatprep.subr.bf16.mxu1 %v3489_v59 }
  0xa3   : > { %838 = vmatmul.mubr.f32.gmra.mrb[4].mxu0 %v4399_v49 }
  0xa4   : > { %842 = vmatprep.mubr.f32.mxu0 %v4175_v15  ;;  %3393 = vmatpush1.bf16.msra.mxu0 %v3392_v50  ;;  %v3404_v50 = vpack.c.bf16 %v524_v42, %v523_v40  ;;  %v531_v40 = vld [vmem:[%s5789_s1 + $0x2a0] sm:$0xff]  ;;  %v532_v42 = vld [vmem:[%s5789_s1 + $0x2a8] sm:$0xff] }
  0xa5   : > { %3394 = vmatprep.subr.bf16.mxu0 %v3898_v3  ;;  %3492 = vmatpush3.bf16.msra.mxu1 %v3489_v59  ;;  %v3505_v59 = vpack.c.bf16 %v588_v57, %v587_v55  ;;  %v3416_v45 = vpack.c.bf16 %v532_v42, %v531_v40  ;;  %v535_v55 = vld [vmem:[%s5789_s1 + $0x2c0] sm:$0xff]  ;;  %v536_v57 = vld [vmem:[%s5789_s1 + $0x2c8] sm:$0xff]  ;;  %v541_v42 = vld [vmem:[%s5789_s1 + $0x2f0] sm:$0xff] }
  0xa6   : > { %3494 = vmatprep.subr.bf16.mxu1 %v3493_v26  ;;  %v4592_v40 = vld [vmem:[%s4017_s15 + $0xc2] sm:$0xff] }
  0xa7   : > { %843 = vmatmul.mubr.f32.gmra.mrb[6].mxu0 %v4417_v61 }
  0xa8   : > { %847 = vmatprep.mubr.f32.mxu0 %v4190_v20  ;;  %3396 = vmatpush1.bf16.msra.mxu0 %v3395_v0  ;;  %v4486_v0 = vld [vmem:[%s4017_s15 + $0x52] sm:$0xff] }
  0xa9   : > { %3397 = vmatprep.subr.bf16.mxu0 %v3898_v3  ;;  %3496 = vmatpush3.bf16.msra.mxu1 %v3493_v26  ;;  %v590_v26 = vld [vmem:[%s5789_s1 + $0x478] sm:$0xff] }
  0xaa   : > { %3498 = vmatprep.subr.bf16.mxu1 %v3497_v37 }
  0xab   : > { %848 = vmatmul.mubr.f32.gmra.mrb[8].mxu0 %v4063_v34 }
  0xac   : > { %852 = vmatprep.mubr.f32.mxu0 %v4205_v25  ;;  %3399 = vmatpush1.bf16.msra.mxu0 %v3398_v28  ;;  %v3509_v28 = vpack.c.bf16 %v590_v26, %v589_v24  ;;  %v4572_v24 = vld [vmem:[%s4017_s15 + $0x9a] sm:$0xff]  ;;  %v3425_v26 = vpack.c.bf16 %v538_v9, %v537_v6  ;;  %v4631_v6 = vld [vmem:[%s4017_s15 + $0xf0] sm:$0xff] }
  0xad   : > { %3400 = vmatprep.subr.bf16.mxu0 %v3898_v3  ;;  %3500 = vmatpush3.bf16.msra.mxu1 %v3497_v37  ;;  %v4516_v37 = vld [vmem:[%s4017_s15 + $0x6a] sm:$0xff]  ;;  %v4637_v9 = vld [vmem:[%s4017_s15 + $0xf8] sm:$0xff] }
  0xae   : > { %3502 = vmatprep.subr.bf16.mxu1 %v3501_v5 }
  0xaf   : > { %853 = vmatmul.mubr.f32.gmra.mrb[10].mxu0 %v4450_v39 }
  0xb0   : > { %857 = vmatprep.mubr.f32.mxu0 %v4220_v30  ;;  %3402 = vmatpush1.bf16.msra.mxu0 %v3401_v63  ;;  %v3413_v63 = vpack.c.bf16 %v530_v35, %v529_v33  ;;  %v540_v33 = vld [vmem:[%s5789_s1 + $0x2e8] sm:$0xff]  ;;  %v4589_v35 = vld [vmem:[%s4017_s15 + $0xb2] sm:$0xff] }
  0xb1   : > { %3403 = vmatprep.subr.bf16.mxu0 %v3898_v3  ;;  %3504 = vmatpush3.bf16.msra.mxu1 %v3501_v5  ;;  %v533_v5 = vld [vmem:[%s5789_s1 + $0x2b0] sm:$0xff] }
  0xb2   : > { %3506 = vmatprep.subr.bf16.mxu1 %v3505_v59 }
  0xb3   : > { %858 = vmatmul.mubr.f32.gmra.mrb[12].mxu0 %v4468_v47 }
  0xb4   : > { %862 = vmatprep.mubr.f32.mxu0 %v4235_v36  ;;  %3405 = vmatpush1.bf16.msra.mxu0 %v3404_v50  ;;  %v534_v50 = vld [vmem:[%s5789_s1 + $0x2b8] sm:$0xff] }
  0xb5   : > { %3406 = vmatprep.subr.bf16.mxu0 %v3898_v3  ;;  %3508 = vmatpush3.bf16.msra.mxu1 %v3505_v59  ;;  %v3419_v54 = vpack.c.bf16 %v534_v50, %v533_v5  ;;  %v4558_v59 = vld [vmem:[%s4017_s15 + $0x92] sm:$0xff]  ;;  %v4606_v5 = vld [vmem:[%s4017_s15 + $0xca] sm:$0xff] }
  0xb6   : > { %3510 = vmatprep.subr.bf16.mxu1 %v3509_v28 }
  0xb7   : > { %863 = vmatmul.mubr.f32.gmra.mrb[14].mxu0 %v4486_v0 }
  0xb8   : > { %867 = vmatprep.mubr.f32.mxu0 %v4250_v41  ;;  %3408 = vmatpush1.bf16.msra.mxu0 %v3407_v4  ;;  %v3422_v4 = vpack.c.bf16 %v536_v57, %v535_v55  ;;  %v4617_v55 = vld [vmem:[%s4017_s15 + $0xe2] sm:$0xff]  ;;  %v4621_v57 = vld [vmem:[%s4017_s15 + $0xf2] sm:$0xff] }
  0xb9   : > { %3409 = vmatprep.subr.bf16.mxu0 %v3898_v3  ;;  %3512 = vmatpush3.bf16.msra.mxu1 %v3509_v28  ;;  %v4575_v28 = vld [vmem:[%s4017_s15 + $0xaa] sm:$0xff] }
  0xbb   : > { %868 = vmatmul.mubr.f32.gmra.mrb[16].mxu0 %v4504_v29 }
  0xbc   : > { %872 = vmatprep.mubr.f32.mxu0 %v4265_v46  ;;  %3411 = vmatpush1.bf16.msra.mxu0 %v3410_v31  ;;  %v539_v31 = vld [vmem:[%s5789_s1 + $0x2e0] sm:$0xff] }
  0xbd   : > { %3412 = vmatprep.subr.bf16.mxu0 %v3898_v3  ;;  %3204 = vmatmul.mubr.f32.vlgmr.msra.gmra.mrb[0].mxu1 %v4450_v39 }
  0xbe   : > { %3206 = vmatprep.mubr.f32.mxu1 %v4468_v47 }
  0xbf   : > { %873 = vmatmul.mubr.f32.gmra.mrb[18].mxu0 %v4516_v37 }
  0xc0   : > { %877 = vmatprep.mubr.f32.mxu0 %v4280_v51  ;;  %3414 = vmatpush1.bf16.msra.mxu0 %v3413_v63  ;;  %v3428_v63 = vpack.c.bf16 %v540_v33, %v539_v31  ;;  %v544_v31 = vld [vmem:[%s5789_s1 + $0x308] sm:$0xff] }
  0xc1   : > { %3415 = vmatprep.subr.bf16.mxu0 %v3898_v3  ;;  %3207 = vmatmul.mubr.f32.gmra.mrb[2].mxu1 %v4486_v0 }
  0xc2   : > { %3209 = vmatprep.mubr.f32.mxu1 %v4504_v29 }
  0xc3   : > { %878 = vmatmul.mubr.f32.gmra.mrb[20].mxu0 %v4530_v44 }
  0xc4   : > { %882 = vmatprep.mubr.f32.mxu0 %v4295_v56  ;;  %3417 = vmatpush1.bf16.msra.mxu0 %v3416_v45  ;;  %v542_v45 = vld [vmem:[%s5789_s1 + $0x2f8] sm:$0xff] }
  0xc5   : > { %3418 = vmatprep.subr.bf16.mxu0 %v3898_v3  ;;  %3210 = vmatmul.mubr.f32.gmra.mrb[4].mxu1 %v4516_v37  ;;  %v3431_v50 = vpack.c.bf16 %v542_v45, %v541_v42  ;;  %v546_v42 = vld [vmem:[%s5789_s1 + $0x318] sm:$0xff] }
  0xc6   : > { %3212 = vmatprep.mubr.f32.mxu1 %v4530_v44 }
  0xc7   : > { %883 = vmatmul.mubr.f32.gmra.mrb[22].mxu0 %v4544_v52 }
  0xc8   : > { %887 = vmatprep.mubr.f32.mxu0 %v4310_v62  ;;  %3420 = vmatpush1.bf16.msra.mxu0 %v3419_v54  ;;  %v4609_v54 = vld [vmem:[%s4017_s15 + $0xda] sm:$0xff] }
  0xc9   : > { %3421 = vmatprep.subr.bf16.mxu0 %v3898_v3  ;;  %3213 = vmatmul.mubr.f32.gmra.mrb[6].mxu1 %v4544_v52 }
  0xca   : > { %3215 = vmatprep.mubr.f32.mxu1 %v4558_v59 }
  0xcb   : > { %888 = vmatmul.mubr.f32.gmra.mrb[24].mxu0 %v4558_v59 }
  0xcc   : > { %892 = vmatprep.mubr.f32.mxu0 %v4325_v8  ;;  %3423 = vmatpush1.bf16.msra.mxu0 %v3422_v4  ;;  %v4628_v4 = vld [vmem:[%s4017_s15 + $0xfa] sm:$0xff] }
  0xcd   : > { %3424 = vmatprep.subr.bf16.mxu0 %v3898_v3  ;;  %3216 = vmatmul.mubr.f32.gmra.mrb[8].mxu1 %v4572_v24 }
  0xce   : > { %3218 = vmatprep.mubr.f32.mxu1 %v4575_v28 }
  0xcf   : > { %893 = vmatmul.mubr.f32.gmra.mrb[26].mxu0 %v4572_v24 }
  0xd0   : > { %897 = vmatprep.mubr.f32.mxu0 %v4334_v13  ;;  %3426 = vmatpush1.bf16.msra.mxu0 %v3425_v26  ;;  %v543_v26 = vld [vmem:[%s5789_s1 + $0x300] sm:$0xff] }
  0xd1   : > { %3427 = vmatprep.subr.bf16.mxu0 %v3898_v3  ;;  %3219 = vmatmul.mubr.f32.gmra.mrb[10].mxu1 %v4589_v35  ;;  %v3434_v33 = vpack.c.bf16 %v544_v31, %v543_v26  ;;  %v550_v26 = vld [vmem:[%s5789_s1 + $0x338] sm:$0xff]  ;;  %v552_v31 = vld [vmem:[%s5789_s1 + $0x348] sm:$0xff] }
  0xd2   : > { %3221 = vmatprep.mubr.f32.mxu1 %v4592_v40 }
  0xd3   : > { %898 = vmatmul.mubr.f32.gmra.mrb[28].mxu0 %v4575_v28 }
  0xd4   : > { %902 = vmatprep.mubr.f32.mxu0 %v4343_v16  ;;  %3429 = vmatpush1.bf16.msra.mxu0 %v3428_v63  ;;  %v545_v63 = vld [vmem:[%s5789_s1 + $0x310] sm:$0xff] }
  0xd5   : > { %3430 = vmatprep.subr.bf16.mxu0 %v3898_v3  ;;  %3222 = vmatmul.mubr.f32.gmra.mrb[12].mxu1 %v4606_v5  ;;  %v3437_v45 = vpack.c.bf16 %v546_v42, %v545_v63  ;;  %v554_v63 = vld [vmem:[%s5789_s1 + $0x358] sm:$0xff]  ;;  %v555_v42 = vld [vmem:[%s5789_s1 + $0x360] sm:$0xff] }
  0xd6   : > { %3224 = vmatprep.mubr.f32.mxu1 %v4609_v54 }
  0xd7   : > { %903 = vmatmul.mubr.f32.gmra.mrb[30].mxu0 %v4589_v35 }
  0xd8   : > { %907 = vmatprep.mubr.f32.mxu0 %v4351_v19  ;;  %3432 = vmatpush1.bf16.msra.mxu0 %v3431_v50  ;;  %v548_v50 = vld [vmem:[%s5789_s1 + $0x328] sm:$0xff] }
  0xd9   : > { %3433 = vmatprep.subr.bf16.mxu0 %v3898_v3  ;;  %3225 = vmatmul.mubr.f32.gmra.mrb[14].mxu1 %v4617_v55 }
  0xda   : > { %3227 = vmatprep.mubr.f32.mxu1 %v4621_v57 }
  0xdb   : > { %908 = vmatmul.mubr.f32.gmra.mrb[32].mxu0 %v4592_v40 }
  0xdc   : > { %912 = vmatprep.mubr.f32.mxu0 %v4359_v23 }
  0xdd   : > { %3228 = vmatmul.mubr.f32.gmra.mrb[16].mxu1 %v4628_v4 }
  0xdf   : > { %913 = vmatmul.mubr.f32.gmra.mrb[34].mxu0 %v4606_v5 }
  0xe0   : > { %917 = vmatprep.mubr.f32.mxu0 %v4631_v6 }
  0xe3   : > { %918 = vmatmul.mubr.f32.gmra.mrb[36].mxu0 %v4609_v54 }
  0xe4   : > { %922 = vmatprep.mubr.f32.mxu0 %v4637_v9 }
  0xe7   : > { %923 = vmatmul.mubr.f32.gmra.mrb[38].mxu0 %v4617_v55 }
  0xe8   : > { %992 = vmatprep.mubr.f32.mxu0 %v4399_v49  ;;  %v547_v49 = vld [vmem:[%s5789_s1 + $0x320] sm:$0xff] }
  0xeb   : > { %993 = vmatmul.mubr.f32.vlgmr.msra.gmra.mrb[0].mxu0 %v4120_v60  ;;  %v3440_v60 = vpack.c.bf16 %v548_v50, %v547_v49  ;;  %v558_v50 = vld [vmem:[%s5789_s1 + $0x378] sm:$0xff] }
  0xec   : > { %3435 = vmatpush1.bf16.msra.mxu0 %v3434_v33  ;;  %997 = vmatprep.mubr.f32.mxu0 %v4417_v61  ;;  %v549_v61 = vld [vmem:[%s5789_s1 + $0x330] sm:$0xff] }
  0xed   : > { %3436 = vmatprep.subr.bf16.mxu0 %v3898_v3 }
  0xef   : > { %998 = vmatmul.mubr.f32.gmra.mrb[2].mxu0 %v4134_v1  ;;  %v3443_v1 = vpack.c.bf16 %v550_v26, %v549_v61  ;;  %v2776_v61 = vld [vmem:[%s4017_s15 + $0x112] sm:$0xff]  ;;  %v559_v26 = vld [vmem:[%s5789_s1 + $0x380] sm:$0xff] }
  0xf0   : > { %3438 = vmatpush1.bf16.msra.mxu0 %v3437_v45  ;;  %1002 = vmatprep.mubr.f32.mxu0 %v4063_v34  ;;  %v551_v34 = vld [vmem:[%s5789_s1 + $0x340] sm:$0xff]  ;;  %v556_v45 = vld [vmem:[%s5789_s1 + $0x368] sm:$0xff] }
  0xf1   : > { %3439 = vmatprep.subr.bf16.mxu0 %v3898_v3  ;;  %v3446_v33 = vpack.c.bf16 %v552_v31, %v551_v34  ;;  %v3452_v49 = vpack.c.bf16 %v556_v45, %v555_v42  ;;  %v562_v31 = vld [vmem:[%s5789_s1 + $0x398] sm:$0xff]  ;;  %v568_v45 = vld [vmem:[%s5789_s1 + $0x3c8] sm:$0xff] }
  0xf3   : > { %1003 = vmatmul.mubr.f32.gmra.mrb[4].mxu0 %v4148_v7 }
  0xf4   : > { %1007 = vmatprep.mubr.f32.mxu0 %v4450_v39  ;;  %3441 = vmatpush1.bf16.msra.mxu0 %v3440_v60  ;;  %v553_v39 = vld [vmem:[%s5789_s1 + $0x350] sm:$0xff] }
  0xf5   : > { %3442 = vmatprep.subr.bf16.mxu0 %v3898_v3  ;;  %v2775_v60 = vld [vmem:[%s4017_s15 + $0x10a] sm:$0xff] }
  0xf6   : > { %3230 = vmatprep.mubr.f32.mxu1 %v2775_v60  ;;  %v572_v60 = vld [vmem:[%s5789_s1 + $0x3e8] sm:$0xff] }
  0xf7   : > { %1008 = vmatmul.mubr.f32.gmra.mrb[6].mxu0 %v4163_v12  ;;  %3231 = vmatmul.mubr.f32.gmra.mrb[18].mxu1 %v2776_v61 }
  0xf8   : > { %1012 = vmatprep.mubr.f32.mxu0 %v4468_v47  ;;  %3444 = vmatpush1.bf16.msra.mxu0 %v3443_v1  ;;  %v3449_v47 = vpack.c.bf16 %v554_v63, %v553_v39  ;;  %v560_v1 = vld [vmem:[%s5789_s1 + $0x388] sm:$0xff] }
  0xf9   : > { %3445 = vmatprep.subr.bf16.mxu0 %v3898_v3  ;;  %v3458_v34 = vpack.c.bf16 %v560_v1, %v559_v26  ;;  %v564_v39 = vld [vmem:[%s5789_s1 + $0x3a8] sm:$0xff]  ;;  %v2695_v26 = vld [vmem:[%s4017_s15 + $0xf1] sm:$0xff] }
  0xfb   : > { %1013 = vmatmul.mubr.f32.gmra.mrb[8].mxu0 %v4178_v17 }
  0xfc   : > { %1017 = vmatprep.mubr.f32.mxu0 %v4486_v0  ;;  %3447 = vmatpush1.bf16.msra.mxu0 %v3446_v33  ;;  %v557_v0 = vld [vmem:[%s5789_s1 + $0x370] sm:$0xff] }
  0xfd   : > { %3448 = vmatprep.subr.bf16.mxu0 %v3898_v3 }
  0xff   : > { %1018 = vmatmul.mubr.f32.gmra.mrb[10].mxu0 %v4193_v22 }
 0x100   : > { %1022 = vmatprep.mubr.f32.mxu0 %v4504_v29  ;;  %3450 = vmatpush1.bf16.msra.mxu0 %v3449_v47  ;;  %v3455_v29 = vpack.c.bf16 %v558_v50, %v557_v0  ;;  %v566_v47 = vld [vmem:[%s5789_s1 + $0x3b8] sm:$0xff] }
 0x101   : > { %3451 = vmatprep.subr.bf16.mxu0 %v3898_v3  ;;  %v570_v0 = vld [vmem:[%s5789_s1 + $0x3d8] sm:$0xff] }
 0x103   : > { %1023 = vmatmul.mubr.f32.gmra.mrb[12].mxu0 %v4208_v27 }
 0x104   : > { %1027 = vmatprep.mubr.f32.mxu0 %v4516_v37  ;;  %3453 = vmatpush1.bf16.msra.mxu0 %v3452_v49  ;;  %v561_v37 = vld [vmem:[%s5789_s1 + $0x390] sm:$0xff] }
 0x105   : > { %3454 = vmatprep.subr.bf16.mxu0 %v3898_v3  ;;  %v3461_v33 = vpack.c.bf16 %v562_v31, %v561_v37 }
 0x107   : > { %1028 = vmatmul.mubr.f32.gmra.mrb[14].mxu0 %v4223_v32 }
 0x108   : > { %1032 = vmatprep.mubr.f32.mxu0 %v4530_v44  ;;  %3456 = vmatpush1.bf16.msra.mxu0 %v3455_v29  ;;  %v563_v44 = vld [vmem:[%s5789_s1 + $0x3a0] sm:$0xff]  ;;  %v574_v29 = vld [vmem:[%s5789_s1 + $0x3f8] sm:$0xff] }
 0x109   : > { %3457 = vmatprep.subr.bf16.mxu0 %v3898_v3  ;;  %v3464_v63 = vpack.c.bf16 %v564_v39, %v563_v44 }
 0x10b   : > { %1033 = vmatmul.mubr.f32.gmra.mrb[16].mxu0 %v4238_v38 }
 0x10c   : > { %1037 = vmatprep.mubr.f32.mxu0 %v4544_v52  ;;  %3459 = vmatpush1.bf16.msra.mxu0 %v3458_v34  ;;  %v565_v52 = vld [vmem:[%s5789_s1 + $0x3b0] sm:$0xff] }
 0x10d   : > { %3460 = vmatprep.subr.bf16.mxu0 %v3898_v3  ;;  %v3467_v42 = vpack.c.bf16 %v566_v47, %v565_v52 }
 0x10f   : > { %1038 = vmatmul.mubr.f32.gmra.mrb[18].mxu0 %v4253_v43 }
 0x110   : > { %1042 = vmatprep.mubr.f32.mxu0 %v4558_v59  ;;  %3462 = vmatpush1.bf16.msra.mxu0 %v3461_v33  ;;  %v567_v59 = vld [vmem:[%s5789_s1 + $0x3c0] sm:$0xff] }
 0x111   : > { %3463 = vmatprep.subr.bf16.mxu0 %v3898_v3  ;;  %v3470_v49 = vpack.c.bf16 %v568_v45, %v567_v59 }
 0x113   : > { %1043 = vmatmul.mubr.f32.gmra.mrb[20].mxu0 %v4268_v48 }
 0x114   : > { %1047 = vmatprep.mubr.f32.mxu0 %v4572_v24  ;;  %3465 = vmatpush1.bf16.msra.mxu0 %v3464_v63  ;;  %v569_v24 = vld [vmem:[%s5789_s1 + $0x3d0] sm:$0xff] }
 0x115   : > { %3466 = vmatprep.subr.bf16.mxu0 %v3898_v3  ;;  %v3473_v50 = vpack.c.bf16 %v570_v0, %v569_v24 }
 0x117   : > { %1048 = vmatmul.mubr.f32.gmra.mrb[22].mxu0 %v4283_v53 }
 0x118   : > { %1052 = vmatprep.mubr.f32.mxu0 %v4575_v28  ;;  %3468 = vmatpush1.bf16.msra.mxu0 %v3467_v42  ;;  %v571_v28 = vld [vmem:[%s5789_s1 + $0x3e0] sm:$0xff] }
 0x119   : > { %3469 = vmatprep.subr.bf16.mxu0 %v3898_v3  ;;  %v3476_v61 = vpack.c.bf16 %v572_v60, %v571_v28 }
 0x11b   : > { %1053 = vmatmul.mubr.f32.gmra.mrb[24].mxu0 %v4298_v58 }
 0x11c   : > { %1057 = vmatprep.mubr.f32.mxu0 %v4589_v35  ;;  %3471 = vmatpush1.bf16.msra.mxu0 %v3470_v49  ;;  %v573_v35 = vld [vmem:[%s5789_s1 + $0x3f0] sm:$0xff] }
 0x11d   : > { %3472 = vmatprep.subr.bf16.mxu0 %v3898_v3 }
 0x11f   : > { %1058 = vmatmul.mubr.f32.gmra.mrb[26].mxu0 %v4313_v2 }
 0x120   : > { %1062 = vmatprep.mubr.f32.mxu0 %v4592_v40  ;;  %3474 = vmatpush1.bf16.msra.mxu0 %v3473_v50  ;;  %v3479_v40 = vpack.c.bf16 %v574_v29, %v573_v35 }
 0x121   : > { %3475 = vmatprep.subr.bf16.mxu0 %v3898_v3 }
 0x123   : > { %1063 = vmatmul.mubr.f32.gmra.mrb[28].mxu0 %v4328_v11 }
 0x124   : > { %1067 = vmatprep.mubr.f32.mxu0 %v4606_v5  ;;  %3477 = vmatpush1.bf16.msra.mxu0 %v3476_v61  ;;  %v2696_v5 = vld [vmem:[%s4017_s15 + $0xf9] sm:$0xff] }
 0x125   : > { %3478 = vmatprep.subr.bf16.mxu0 %v3898_v3  ;;  %v2755_v3 = vld [vmem:[%s4017_s15 + $0x109] sm:$0xff] }
 0x127   : > { %1068 = vmatmul.mubr.f32.gmra.mrb[30].mxu0 %v4337_v14 }
 0x128   : > { %1072 = vmatprep.mubr.f32.mxu0 %v4609_v54  ;;  %3480 = vmatpush1.bf16.msra.mxu0 %v3479_v40 }
 0x12b   : > { %1073 = vmatmul.mubr.f32.gmra.mrb[32].mxu0 %v4346_v18 }
 0x12c   : > { %1077 = vmatprep.mubr.f32.mxu0 %v4617_v55 }
 0x12f   : > { %1078 = vmatmul.mubr.f32.gmra.mrb[34].mxu0 %v4354_v21 }
 0x130   : > { %1082 = vmatprep.mubr.f32.mxu0 %v4621_v57 }
 0x133   : > { %1083 = vmatmul.mubr.f32.gmra.mrb[36].mxu0 %v2695_v26 }
 0x134   : > { %1087 = vmatprep.mubr.f32.mxu0 %v4628_v4 }
 0x137   : > { %1088 = vmatmul.mubr.f32.gmra.mrb[38].mxu0 %v2696_v5 }
 0x138   : > { %1157 = vmatprep.mubr.f32.mxu0 %v4148_v7  ;;  %v2735_v7 = vld [vmem:[%s4017_s15 + $0x108] sm:$0xff] }
 0x13b   : > { %1158 = vmatmul.mubr.f32.vlgmr.msra.gmra.mrb[0].mxu0 %v4160_v10  ;;  %v2756_v10 = vld [vmem:[%s4017_s15 + $0x111] sm:$0xff] }
 0x13c   : > { %1162 = vmatprep.mubr.f32.mxu0 %v4163_v12  ;;  %v2736_v12 = vld [vmem:[%s4017_s15 + $0x110] sm:$0xff] }
 0x13f   : > { %1163 = vmatmul.mubr.f32.gmra.mrb[2].mxu0 %v4175_v15 }
 0x140   : > { %1167 = vmatprep.mubr.f32.mxu0 %v4178_v17 }
 0x143   : > { %1168 = vmatmul.mubr.f32.gmra.mrb[4].mxu0 %v4190_v20 }
 0x144   : > { %1172 = vmatprep.mubr.f32.mxu0 %v4193_v22 }
 0x147   : > { %1173 = vmatmul.mubr.f32.gmra.mrb[6].mxu0 %v4205_v25 }
 0x148   : > { %1177 = vmatprep.mubr.f32.mxu0 %v4208_v27 }
 0x14b   : > { %1178 = vmatmul.mubr.f32.gmra.mrb[8].mxu0 %v4220_v30 }
 0x14c   : > { %1182 = vmatprep.mubr.f32.mxu0 %v4223_v32 }
 0x14f   : > { %1183 = vmatmul.mubr.f32.gmra.mrb[10].mxu0 %v4235_v36 }
 0x150   : > { %1187 = vmatprep.mubr.f32.mxu0 %v4238_v38 }
 0x153   : > { %1188 = vmatmul.mubr.f32.gmra.mrb[12].mxu0 %v4250_v41 }
 0x154   : > { %1192 = vmatprep.mubr.f32.mxu0 %v4253_v43 }
 0x157   : > { %1193 = vmatmul.mubr.f32.gmra.mrb[14].mxu0 %v4265_v46 }
 0x158   : > { %1197 = vmatprep.mubr.f32.mxu0 %v4268_v48 }
 0x15b   : > { %1198 = vmatmul.mubr.f32.gmra.mrb[16].mxu0 %v4280_v51 }
 0x15c   : > { %1202 = vmatprep.mubr.f32.mxu0 %v4283_v53 }
 0x15f   : > { %1203 = vmatmul.mubr.f32.gmra.mrb[18].mxu0 %v4295_v56 }
 0x160   : > { %1207 = vmatprep.mubr.f32.mxu0 %v4298_v58 }
 0x163   : > { %1208 = vmatmul.mubr.f32.gmra.mrb[20].mxu0 %v4310_v62 }
 0x164   : > { %1212 = vmatprep.mubr.f32.mxu0 %v4313_v2 }
 0x167   : > { %1213 = vmatmul.mubr.f32.gmra.mrb[22].mxu0 %v4325_v8  ;;  %v3899_v8 = vmov 0.0  }
 0x168   : > { %1217 = vmatprep.mubr.f32.mxu0 %v4328_v11  ;;  %1443 = vst [vmem:[#allocation2] sm:$0x1] %v3899_v8  ;;  %1444 = vst [vmem:[#allocation2 + $0x18] sm:$0x1] %v3899_v8  ;;  %v4868_v11 = vld [vmem:[%s5790_s2] ss:$0 sm:$0xff] }
 0x169   : > { %1445 = vst [vmem:[#allocation2 + $0x30] sm:$0x1] %v3899_v8  ;;  %1446 = vst [vmem:[#allocation2 + $0x48] sm:$0x1] %v3899_v8 }
 0x16a   : > { %1447 = vst [vmem:[#allocation2 + $0x60] sm:$0x1] %v3899_v8  ;;  %1448 = vst [vmem:[#allocation2 + $0x78] sm:$0x1] %v3899_v8 }
 0x16b   : > { %1218 = vmatmul.mubr.f32.gmra.mrb[24].mxu0 %v4334_v13  ;;  %1449 = vst [vmem:[#allocation2 + $0x90] sm:$0x1] %v3899_v8  ;;  %1450 = vst [vmem:[#allocation2 + $0xa8] sm:$0x1] %v3899_v8 }
 0x16c   : > { %1222 = vmatprep.mubr.f32.mxu0 %v4337_v14  ;;  %1451 = vst [vmem:[#allocation2 + $0xc0] sm:$0x1] %v3899_v8  ;;  %1452 = vst [vmem:[#allocation2 + $0xd8] sm:$0x1] %v3899_v8 }
 0x16d   : > { %1453 = vst [vmem:[#allocation2 + $0x11] sm:$0x1] %v3899_v8  ;;  %1454 = vst [vmem:[#allocation2 + $0x29] sm:$0x1] %v3899_v8 }
 0x16e   : > { %1455 = vst [vmem:[#allocation2 + $0x41] sm:$0x1] %v3899_v8  ;;  %1456 = vst [vmem:[#allocation2 + $0x59] sm:$0x1] %v3899_v8 }
 0x16f   : > { %1223 = vmatmul.mubr.f32.gmra.mrb[26].mxu0 %v4343_v16  ;;  %1457 = vst [vmem:[#allocation2 + $0x71] sm:$0x1] %v3899_v8  ;;  %1458 = vst [vmem:[#allocation2 + $0x89] sm:$0x1] %v3899_v8 }
 0x170   : > { %1227 = vmatprep.mubr.f32.mxu0 %v4346_v18  ;;  %1459 = vst [vmem:[#allocation2 + $0xa1] sm:$0x1] %v3899_v8  ;;  %1460 = vst [vmem:[#allocation2 + $0xb9] sm:$0x1] %v3899_v8 }
 0x171   : > { %1461 = vst [vmem:[#allocation2 + $0xd1] sm:$0x1] %v3899_v8  ;;  %1462 = vst [vmem:[#allocation2 + $0xe9] sm:$0x1] %v3899_v8 }
 0x173   : > { %1228 = vmatmul.mubr.f32.gmra.mrb[28].mxu0 %v4351_v19 }
 0x174   : > { %1232 = vmatprep.mubr.f32.mxu0 %v4354_v21 }
 0x177   : > { %1233 = vmatmul.mubr.f32.gmra.mrb[30].mxu0 %v4359_v23 }
 0x178   : > { %1237 = vmatprep.mubr.f32.mxu0 %v2695_v26 }
 0x17b   : > { %1238 = vmatmul.mubr.f32.gmra.mrb[32].mxu0 %v4631_v6 }
 0x17c   : > { %1242 = vmatprep.mubr.f32.mxu0 %v2696_v5 }
 0x17f   : > { %1243 = vmatmul.mubr.f32.gmra.mrb[34].mxu0 %v4637_v9 }
 0x180   : > { %1247 = vmatprep.mubr.f32.mxu0 %v2755_v3 }
 0x183   : > { %1248 = vmatmul.mubr.f32.gmra.mrb[36].mxu0 %v2735_v7 }
 0x184   : > { %1252 = vmatprep.mubr.f32.mxu0 %v2756_v10 }
 0x187   : > { %1253 = vmatmul.mubr.f32.gmra.mrb[38].mxu0 %v2736_v12 }
 0x190   : > { %v3205_v15 = vpop.f32.mrb[0].mxu1 }
 0x191   : > { %v1324_v17 = vpop.f32.mrb[1].mxu1 }
 0x194   : > { %v3208_v20 = vpop.f32.mrb[2].mxu1 }
 0x195   : > { %v1334_v22 = vpop.f32.mrb[3].mxu1 }
 0x198   : > { %v4833_v25 = vpop.f32.mrb[4].mxu1 }
 0x199   : > { %v4835_v27 = vpop.f32.mrb[5].mxu1 }
 0x19c   : > { %v4837_v30 = vpop.f32.mrb[6].mxu1 }
 0x19d   : > { %v4839_v32 = vpop.f32.mrb[7].mxu1 }
 0x1a0   : > { %v4841_v36 = vpop.f32.mrb[8].mxu1 }
 0x1a1   : > { %v4843_v38 = vpop.f32.mrb[9].mxu1 }
 0x1a4   : > { %v4845_v41 = vpop.f32.mrb[10].mxu1 }
 0x1a5   : > { %v4847_v43 = vpop.f32.mrb[11].mxu1 }
 0x1a8   : > { %v4849_v46 = vpop.f32.mrb[12].mxu1 }
 0x1a9   : > { %v4851_v48 = vpop.f32.mrb[13].mxu1 }
 0x1ac   : > { %v4853_v51 = vpop.f32.mrb[14].mxu1 }
 0x1ad   : > { %v4855_v53 = vpop.f32.mrb[15].mxu1 }
 0x1b0   : > { %v4857_v56 = vpop.f32.mrb[16].mxu1 }
 0x1b1   : > { %v4859_v58 = vpop.f32.mrb[17].mxu1 }
 0x1ca   : > { %v4861_v62 = vpop.f32.mrb[18].mxu1 }
 0x1cb   : > { %v4863_v2 = vpop.f32.mrb[19].mxu1 }
 0x20e   : > { %v1159_v13 = vpop.f32.mrb[0].mxu0 }
 0x20f   : > { %v3673_v14 = vadd.f32 %v4868_v11, %v1159_v13  ;;  %v1161_v16 = vpop.f32.mrb[1].mxu0 }
 0x211   : > { %v1325_v18 = vadd.f32 %v3673_v14, %v1324_v17 }
 0x212   : > { %v1164_v19 = vpop.f32.mrb[2].mxu0 }
 0x213   : > { %v1423_v21 = vmax.f32 %v1325_v18, 0.0  ;;  %v3674_v23 = vadd.f32 %v4868_v11, %v1164_v19  ;;  %v1166_v54 = vpop.f32.mrb[3].mxu0 }
 0x215   : > { %1463 = vst [vmem:[#allocation2 + $0x1] sm:$0xff] %v1423_v21  ;;  %v1330_v55 = vadd.f32 %v3674_v23, %v3205_v15 }
 0x216   : > { %v1169_v57 = vpop.f32.mrb[4].mxu0 }
 0x217   : > { %v1424_v4 = vmax.f32 %v1330_v55, 0.0  ;;  %v3675_v6 = vadd.f32 %v4868_v11, %v1169_v57  ;;  %v1171_v9 = vpop.f32.mrb[5].mxu0 }
 0x219   : > { %1464 = vst [vmem:[#allocation2 + $0x9] sm:$0xff] %v1424_v4  ;;  %v1335_v1 = vadd.f32 %v3675_v6, %v1334_v22 }
 0x21a   : > { %v1174_v34 = vpop.f32.mrb[6].mxu0 }
 0x21b   : > { %v1425_v37 = vmax.f32 %v1335_v1, 0.0  ;;  %v3676_v31 = vadd.f32 %v4868_v11, %v1174_v34  ;;  %v1176_v33 = vpop.f32.mrb[7].mxu0 }
 0x21d   : > { %1465 = vst [vmem:[#allocation2 + $0x19] sm:$0xff] %v1425_v37  ;;  %v1340_v44 = vadd.f32 %v3676_v31, %v3208_v20 }
 0x21e   : > { %v1179_v39 = vpop.f32.mrb[8].mxu0 }
 0x21f   : > { %v1426_v63 = vmax.f32 %v1340_v44, 0.0  ;;  %v3677_v52 = vadd.f32 %v4868_v11, %v1179_v39  ;;  %v1181_v47 = vpop.f32.mrb[9].mxu0 }
 0x221   : > { %1466 = vst [vmem:[#allocation2 + $0x21] sm:$0xff] %v1426_v63  ;;  %v1345_v42 = vadd.f32 %v3677_v52, %v4835_v27 }
 0x222   : > { %v1184_v59 = vpop.f32.mrb[10].mxu0 }
 0x223   : > { %v1427_v45 = vmax.f32 %v1345_v42, 0.0  ;;  %v3678_v49 = vadd.f32 %v4868_v11, %v1184_v59  ;;  %v1186_v24 = vpop.f32.mrb[11].mxu0 }
 0x225   : > { %1467 = vst [vmem:[#allocation2 + $0x31] sm:$0xff] %v1427_v45  ;;  %v1350_v0 = vadd.f32 %v3678_v49, %v4833_v25 }
 0x226   : > { %v1189_v50 = vpop.f32.mrb[12].mxu0 }
 0x227   : > { %v1428_v28 = vmax.f32 %v1350_v0, 0.0  ;;  %v3679_v60 = vadd.f32 %v4868_v11, %v1189_v50  ;;  %v1191_v61 = vpop.f32.mrb[13].mxu0 }
 0x229   : > { %1468 = vst [vmem:[#allocation2 + $0x39] sm:$0xff] %v1428_v28  ;;  %v1355_v35 = vadd.f32 %v3679_v60, %v4839_v32 }
 0x22a   : > { %v1194_v29 = vpop.f32.mrb[14].mxu0 }
 0x22b   : > { %v1429_v40 = vmax.f32 %v1355_v35, 0.0  ;;  %v3680_v26 = vadd.f32 %v4868_v11, %v1194_v29  ;;  %v1196_v5 = vpop.f32.mrb[15].mxu0 }
 0x22d   : > { %1469 = vst [vmem:[#allocation2 + $0x49] sm:$0xff] %v1429_v40  ;;  %v1360_v3 = vadd.f32 %v3680_v26, %v4837_v30 }
 0x22e   : > { %v1199_v7 = vpop.f32.mrb[16].mxu0 }
 0x22f   : > { %v1430_v10 = vmax.f32 %v1360_v3, 0.0  ;;  %v3681_v12 = vadd.f32 %v4868_v11, %v1199_v7  ;;  %v1201_v15 = vpop.f32.mrb[17].mxu0 }
 0x231   : > { %1470 = vst [vmem:[#allocation2 + $0x51] sm:$0xff] %v1430_v10  ;;  %v1365_v17 = vadd.f32 %v3681_v12, %v4843_v38 }
 0x232   : > { %v1204_v20 = vpop.f32.mrb[18].mxu0 }
 0x233   : > { %v1431_v22 = vmax.f32 %v1365_v17, 0.0  ;;  %v3682_v25 = vadd.f32 %v4868_v11, %v1204_v20  ;;  %v1206_v27 = vpop.f32.mrb[19].mxu0 }
 0x235   : > { %1471 = vst [vmem:[#allocation2 + $0x61] sm:$0xff] %v1431_v22  ;;  %v1370_v32 = vadd.f32 %v3682_v25, %v4841_v36 }
 0x236   : > { %v1209_v8 = vpop.f32.mrb[20].mxu0 }
 0x237   : > { %v1432_v13 = vmax.f32 %v1370_v32, 0.0  ;;  %v3683_v30 = vadd.f32 %v4868_v11, %v1209_v8  ;;  %v1211_v14 = vpop.f32.mrb[21].mxu0 }
 0x239   : > { %1472 = vst [vmem:[#allocation2 + $0x69] sm:$0xff] %v1432_v13  ;;  %v1375_v16 = vadd.f32 %v3683_v30, %v4847_v43 }
 0x23a   : > { %v1214_v18 = vpop.f32.mrb[22].mxu0 }
 0x23b   : > { %v1433_v19 = vmax.f32 %v1375_v16, 0.0  ;;  %v3684_v38 = vadd.f32 %v4868_v11, %v1214_v18  ;;  %v1216_v21 = vpop.f32.mrb[23].mxu0 }
 0x23d   : > { %1473 = vst [vmem:[#allocation2 + $0x79] sm:$0xff] %v1433_v19  ;;  %v1380_v23 = vadd.f32 %v3684_v38, %v4845_v41 }
 0x23e   : > { %v1219_v54 = vpop.f32.mrb[24].mxu0 }
 0x23f   : > { %v1434_v55 = vmax.f32 %v1380_v23, 0.0  ;;  %v3685_v36 = vadd.f32 %v4868_v11, %v1219_v54  ;;  %v1221_v57 = vpop.f32.mrb[25].mxu0 }
 0x241   : > { %1474 = vst [vmem:[#allocation2 + $0x81] sm:$0xff] %v1434_v55  ;;  %v1385_v4 = vadd.f32 %v3685_v36, %v4851_v48 }
 0x242   : > { %v1224_v6 = vpop.f32.mrb[26].mxu0 }
 0x243   : > { %v1435_v9 = vmax.f32 %v1385_v4, 0.0  ;;  %v3686_v43 = vadd.f32 %v4868_v11, %v1224_v6  ;;  %v1226_v1 = vpop.f32.mrb[27].mxu0 }
 0x245   : > { %1475 = vst [vmem:[#allocation2 + $0x91] sm:$0xff] %v1435_v9  ;;  %v1390_v34 = vadd.f32 %v3686_v43, %v4849_v46 }
 0x246   : > { %v1229_v37 = vpop.f32.mrb[28].mxu0 }
 0x247   : > { %v1436_v31 = vmax.f32 %v1390_v34, 0.0  ;;  %v3687_v41 = vadd.f32 %v4868_v11, %v1229_v37  ;;  %v1231_v33 = vpop.f32.mrb[29].mxu0 }
 0x249   : > { %1476 = vst [vmem:[#allocation2 + $0x99] sm:$0xff] %v1436_v31  ;;  %v1395_v44 = vadd.f32 %v3687_v41, %v4855_v53 }
 0x24a   : > { %v1234_v39 = vpop.f32.mrb[30].mxu0 }
 0x24b   : > { %v1437_v63 = vmax.f32 %v1395_v44, 0.0  ;;  %v3688_v48 = vadd.f32 %v4868_v11, %v1234_v39  ;;  %v1236_v52 = vpop.f32.mrb[31].mxu0 }
 0x24d   : > { %1477 = vst [vmem:[#allocation2 + $0xa9] sm:$0xff] %v1437_v63  ;;  %v1400_v47 = vadd.f32 %v3688_v48, %v4853_v51 }
 0x24e   : > { %v1239_v42 = vpop.f32.mrb[32].mxu0 }
 0x24f   : > { %v1438_v59 = vmax.f32 %v1400_v47, 0.0  ;;  %v3689_v46 = vadd.f32 %v4868_v11, %v1239_v42  ;;  %v1241_v45 = vpop.f32.mrb[33].mxu0 }
 0x251   : > { %1478 = vst [vmem:[#allocation2 + $0xb1] sm:$0xff] %v1438_v59  ;;  %v1405_v49 = vadd.f32 %v3689_v46, %v4859_v58 }
 0x252   : > { %v1244_v24 = vpop.f32.mrb[34].mxu0 }
 0x253   : > { %v1439_v0 = vmax.f32 %v1405_v49, 0.0  ;;  %v3690_v53 = vadd.f32 %v4868_v11, %v1244_v24  ;;  %v1246_v50 = vpop.f32.mrb[35].mxu0 }
 0x255   : > { %1479 = vst [vmem:[#allocation2 + $0xc1] sm:$0xff] %v1439_v0  ;;  %v1410_v28 = vadd.f32 %v3690_v53, %v4857_v56  ;;  %v3900_v56 = vmov (!%p2778_p8), 0.0  }
 0x256   : > { %v1249_v60 = vpop.f32.mrb[36].mxu0  ;;  %1487 = vst [vmem:[#allocation2] sm:$0xff] (!%p2778_p8), %v3900_v56  ;;  %1488 = vst [vmem:[#allocation2 + $0x8] sm:$0xff] (!%p2778_p8), %v3900_v56 }
 0x257   : > { %v1440_v61 = vmax.f32 %v1410_v28, 0.0  ;;  %v3691_v51 = vadd.f32 %v4868_v11, %v1249_v60  ;;  %v1251_v35 = vpop.f32.mrb[37].mxu0  ;;  %1489 = vst [vmem:[#allocation2 + $0x10] sm:$0x3] (!%p2778_p8), %v3900_v56 }
 0x259   : > { %1480 = vst [vmem:[#allocation2 + $0xc9] sm:$0xff] %v1440_v61  ;;  %v1415_v29 = vadd.f32 %v3691_v51, %v4863_v2 }
 0x25a   : > { %v1254_v40 = vpop.f32.mrb[38].mxu0 }
 0x25b   : > { %v1441_v26 = vmax.f32 %v1415_v29, 0.0  ;;  %v3692_v58 = vadd.f32 %v4868_v11, %v1254_v40  ;;  %v1256_v5 = vpop.f32.mrb[39].mxu0  ;;  %1486 = sbr.rel (%p2778_p8) target bundleno = 610 (0x262), region = 44 }
 0x25d   : > { %1481 = vst [vmem:[#allocation2 + $0xd9] sm:$0xff] %v1441_v26  ;;  %v1420_v3 = vadd.f32 %v3692_v58, %v4861_v62 }
 0x25f   : > { %v1442_v7 = vmax.f32 %v1420_v3, 0.0 }
 0x261   : > { %1482 = vst [vmem:[#allocation2 + $0xe1] sm:$0xff] %v1442_v7 }
 0x262 PF: > { %s1490_s12 = sadd.s32 8, %s3967_s25 }
 0x263   : > { %p2779_p9 = scmp.ne.s32.totalorder %s1490_s12, 16 }
 0x264   : > { %v3901_v2 = vmov (!%p2779_p9), 0.0  }
 0x265   : > { %1494 = sbr.rel (%p2779_p9) target bundleno = 620 (0x26c), region = 48  ;;  %1496 = vst [vmem:[#allocation2 + $0xd8] sm:$0xff] (!%p2779_p9), %v3901_v2  ;;  %1497 = vst [vmem:[#allocation2 + $0xe0] sm:$0xff] (!%p2779_p9), %v3901_v2 }
 0x266   : > { %1498 = vst [vmem:[#allocation2 + $0xe8] sm:$0x3] (!%p2779_p9), %v3901_v2 }
 0x26c PF: > { %v1661_v62 = vld [vmem:[%s5791_s3 + $0x80] sm:$0xff]  ;;  %v1662_v11 = vld [vmem:[%s5791_s3 + $0x88] sm:$0xff]  ;;  %v1663_v17 = vld [vmem:[%s5791_s3 + $0x90] sm:$0xff] }
 0x26d   : > { %v1645_v10 = vld [vmem:[%s5791_s3] sm:$0xff]  ;;  %v3513_v12 = vpack.c.bf16 %v1662_v11, %v1661_v62  ;;  %v1646_v15 = vld [vmem:[%s5791_s3 + $0x8] sm:$0xff]  ;;  %v1664_v20 = vld [vmem:[%s5791_s3 + $0x98] sm:$0xff] }
 0x26e   : > { %v3515_v22 = vpack.c.bf16 %v1646_v15, %v1645_v10  ;;  %v3517_v25 = vpack.c.bf16 %v1664_v20, %v1663_v17  ;;  %v1647_v27 = vld [vmem:[%s5791_s3 + $0x10] sm:$0xff]  ;;  %v1648_v32 = vld [vmem:[%s5791_s3 + $0x18] sm:$0xff]  ;;  %v1665_v8 = vld [vmem:[%s5791_s3 + $0xa0] sm:$0xff] }
 0x26f   : > { %3514 = vmatprep.subr.bf16.mxu1 %v3513_v12  ;;  %v1666_v13 = vld [vmem:[%s5791_s3 + $0xa8] sm:$0xff]  ;;  %v3519_v30 = vpack.c.bf16 %v1648_v32, %v1647_v27  ;;  %v1649_v16 = vld [vmem:[%s5791_s3 + $0x20] sm:$0xff]  ;;  %v1667_v19 = vld [vmem:[%s5791_s3 + $0xb0] sm:$0xff] }
 0x270   : > { %3516 = vmatpush3.bf16.msra.mxu1 %v3515_v22  ;;  %v3521_v14 = vpack.c.bf16 %v1666_v13, %v1665_v8  ;;  %v1650_v18 = vld [vmem:[%s5791_s3 + $0x28] sm:$0xff]  ;;  %v1668_v38 = vld [vmem:[%s5791_s3 + $0xb8] sm:$0xff]  ;;  %v1651_v54 = vld [vmem:[%s5791_s3 + $0x30] sm:$0xff] }
 0x271   : > { %3518 = vmatprep.subr.bf16.mxu1 %v3517_v25  ;;  %v3523_v21 = vpack.c.bf16 %v1650_v18, %v1649_v16  ;;  %v3525_v23 = vpack.c.bf16 %v1668_v38, %v1667_v19  ;;  %v1652_v55 = vld [vmem:[%s5791_s3 + $0x38] sm:$0xff]  ;;  %v1669_v36 = vld [vmem:[%s5791_s3 + $0xc0] sm:$0xff]  ;;  %v1670_v57 = vld [vmem:[%s5791_s3 + $0xc8] sm:$0xff] }
 0x272   : > { %v1515_v4 = vld [vmem:[#allocation2 + $0x1] sm:$0xff]  ;;  %v3527_v6 = vpack.c.bf16 %v1652_v55, %v1651_v54  ;;  %v3529_v9 = vpack.c.bf16 %v1670_v57, %v1669_v36  ;;  %v1671_v34 = vld [vmem:[%s5791_s3 + $0xd0] sm:$0xff]  ;;  %v1672_v37 = vld [vmem:[%s5791_s3 + $0xd8] sm:$0xff] }
 0x273   : > { %1860 = vmatprep.mubr.f32.mxu1 %v1515_v4  ;;  %v1653_v43 = vld [vmem:[%s5791_s3 + $0x40] sm:$0xff]  ;;  %v1654_v1 = vld [vmem:[%s5791_s3 + $0x48] sm:$0xff]  ;;  %v3533_v41 = vpack.c.bf16 %v1672_v37, %v1671_v34  ;;  %v1655_v33 = vld [vmem:[%s5791_s3 + $0x50] sm:$0xff] }
 0x274   : > { %3520 = vmatpush3.bf16.msra.mxu1 %v3519_v30  ;;  %v3531_v31 = vpack.c.bf16 %v1654_v1, %v1653_v43  ;;  %v1656_v44 = vld [vmem:[%s5791_s3 + $0x58] sm:$0xff]  ;;  %v1673_v39 = vld [vmem:[%s5791_s3 + $0xe0] sm:$0xff]  ;;  %v1674_v63 = vld [vmem:[%s5791_s3 + $0xe8] sm:$0xff] }
 0x275   : > { %3522 = vmatprep.subr.bf16.mxu1 %v3521_v14  ;;  %v3535_v48 = vpack.c.bf16 %v1656_v44, %v1655_v33  ;;  %v3537_v52 = vpack.c.bf16 %v1674_v63, %v1673_v39  ;;  %v1657_v47 = vld [vmem:[%s5791_s3 + $0x60] sm:$0xff]  ;;  %v1658_v42 = vld [vmem:[%s5791_s3 + $0x68] sm:$0xff]  ;;  %v1675_v59 = vld [vmem:[%s5791_s3 + $0xf0] sm:$0xff] }
 0x276   : > { %v1676_v46 = vld [vmem:[%s5791_s3 + $0xf8] sm:$0xff]  ;;  %v3539_v45 = vpack.c.bf16 %v1658_v42, %v1657_v47  ;;  %v1659_v24 = vld [vmem:[%s5791_s3 + $0x70] sm:$0xff]  ;;  %v1693_v53 = vld [vmem:[%s5791_s3 + $0x180] sm:$0xff] }
 0x277   : > { %v3541_v49 = vpack.c.bf16 %v1676_v46, %v1675_v59  ;;  %v1660_v0 = vld [vmem:[%s5791_s3 + $0x78] sm:$0xff]  ;;  %v1694_v50 = vld [vmem:[%s5791_s3 + $0x188] sm:$0xff]  ;;  %v1677_v61 = vld [vmem:[%s5791_s3 + $0x100] sm:$0xff] }
 0x278   : > { %3524 = vmatpush3.bf16.msra.mxu1 %v3523_v21  ;;  %v3543_v28 = vpack.c.bf16 %v1660_v0, %v1659_v24  ;;  %v3545_v60 = vpack.c.bf16 %v1694_v50, %v1693_v53  ;;  %v1678_v51 = vld [vmem:[%s5791_s3 + $0x108] sm:$0xff]  ;;  %v1695_v35 = vld [vmem:[%s5791_s3 + $0x190] sm:$0xff]  ;;  %v1696_v29 = vld [vmem:[%s5791_s3 + $0x198] sm:$0xff] }
 0x279   : > { %3526 = vmatprep.subr.bf16.mxu1 %v3525_v23  ;;  %v1499_v40 = vld [vmem:[#allocation2] sm:$0xff]  ;;  %v3547_v26 = vpack.c.bf16 %v1678_v51, %v1677_v61  ;;  %v1516_v58 = vld [vmem:[#allocation2 + $0x9] sm:$0xff]  ;;  %v3549_v5 = vpack.c.bf16 %v1696_v29, %v1695_v35  ;;  %v1680_v7 = vld [vmem:[%s5791_s3 + $0x118] sm:$0xff] }
 0x27a   : > { %v1679_v3 = vld [vmem:[%s5791_s3 + $0x110] sm:$0xff]  ;;  %v1697_v56 = vld [vmem:[%s5791_s3 + $0x1a0] sm:$0xff]  ;;  %v1698_v2 = vld [vmem:[%s5791_s3 + $0x1a8] sm:$0xff] }
 0x27b   : > { %v1500_v62 = vld [vmem:[#allocation2 + $0x8] sm:$0xff]  ;;  %v3551_v11 = vpack.c.bf16 %v1680_v7, %v1679_v3  ;;  %v5034_v10 = vld [vmem:[#allocation2 + $0x19] sm:$0xff]  ;;  %v3553_v12 = vpack.c.bf16 %v1698_v2, %v1697_v56  ;;  %v1699_v20 = vld [vmem:[%s5791_s3 + $0x1b0] sm:$0xff] }
 0x27c   : > { %3528 = vmatpush3.bf16.msra.mxu1 %v3527_v6  ;;  %v1681_v15 = vld [vmem:[%s5791_s3 + $0x120] sm:$0xff]  ;;  %v1682_v17 = vld [vmem:[%s5791_s3 + $0x128] sm:$0xff]  ;;  %v1700_v22 = vld [vmem:[%s5791_s3 + $0x1b8] sm:$0xff] }
 0x27d   : > { %3530 = vmatprep.subr.bf16.mxu1 %v3529_v9  ;;  %v5049_v25 = vld [vmem:[#allocation2 + $0x18] sm:$0xff]  ;;  %v3555_v27 = vpack.c.bf16 %v1682_v17, %v1681_v15  ;;  %v5051_v32 = vld [vmem:[#allocation2 + $0x21] sm:$0xff]  ;;  %v3557_v8 = vpack.c.bf16 %v1700_v22, %v1699_v20  ;;  %v1683_v13 = vld [vmem:[%s5791_s3 + $0x130] sm:$0xff] }
 0x27e   : > { %v1684_v30 = vld [vmem:[%s5791_s3 + $0x138] sm:$0xff]  ;;  %v1701_v14 = vld [vmem:[%s5791_s3 + $0x1c0] sm:$0xff]  ;;  %v1702_v16 = vld [vmem:[%s5791_s3 + $0x1c8] sm:$0xff] }
 0x27f   : > { %v5067_v18 = vld [vmem:[#allocation2 + $0x20] sm:$0xff]  ;;  %v3559_v19 = vpack.c.bf16 %v1684_v30, %v1683_v13  ;;  %v5069_v38 = vld [vmem:[#allocation2 + $0x31] sm:$0xff]  ;;  %v3561_v21 = vpack.c.bf16 %v1702_v16, %v1701_v14  ;;  %v1686_v54 = vld [vmem:[%s5791_s3 + $0x148] sm:$0xff] }
 0x280   : > { %3532 = vmatpush3.bf16.msra.mxu1 %v3531_v31  ;;  %v1685_v23 = vld [vmem:[%s5791_s3 + $0x140] sm:$0xff]  ;;  %v1703_v55 = vld [vmem:[%s5791_s3 + $0x1d0] sm:$0xff]  ;;  %v1704_v36 = vld [vmem:[%s5791_s3 + $0x1d8] sm:$0xff] }
 0x281   : > { %3534 = vmatprep.subr.bf16.mxu1 %v3533_v41  ;;  %v5085_v57 = vld [vmem:[#allocation2 + $0x30] sm:$0xff]  ;;  %v3563_v4 = vpack.c.bf16 %v1686_v54, %v1685_v23  ;;  %v5087_v6 = vld [vmem:[#allocation2 + $0x39] sm:$0xff]  ;;  %v3565_v9 = vpack.c.bf16 %v1704_v36, %v1703_v55  ;;  %v1706_v37 = vld [vmem:[%s5791_s3 + $0x1e8] sm:$0xff] }
 0x282   : > { %v1687_v43 = vld [vmem:[%s5791_s3 + $0x150] sm:$0xff]  ;;  %v1688_v1 = vld [vmem:[%s5791_s3 + $0x158] sm:$0xff]  ;;  %v1705_v34 = vld [vmem:[%s5791_s3 + $0x1e0] sm:$0xff] }
 0x283   : > { %v5103_v31 = vld [vmem:[#allocation2 + $0x38] sm:$0xff]  ;;  %v3567_v41 = vpack.c.bf16 %v1688_v1, %v1687_v43  ;;  %v5105_v33 = vld [vmem:[#allocation2 + $0x49] sm:$0xff]  ;;  %v3569_v44 = vpack.c.bf16 %v1706_v37, %v1705_v34  ;;  %v1689_v39 = vld [vmem:[%s5791_s3 + $0x160] sm:$0xff] }
 0x284   : > { %3536 = vmatpush3.bf16.msra.mxu1 %v3535_v48  ;;  %v1690_v63 = vld [vmem:[%s5791_s3 + $0x168] sm:$0xff]  ;;  %v1707_v48 = vld [vmem:[%s5791_s3 + $0x1f0] sm:$0xff]  ;;  %v1725_v24 = vld [vmem:[%s5791_s3 + $0x280] sm:$0xff] }
 0x285   : > { %3538 = vmatprep.subr.bf16.mxu1 %v3537_v52  ;;  %v1708_v52 = vld [vmem:[%s5791_s3 + $0x1f8] sm:$0xff]  ;;  %v5121_v47 = vld [vmem:[#allocation2 + $0x48] sm:$0xff]  ;;  %v3571_v42 = vpack.c.bf16 %v1690_v63, %v1689_v39  ;;  %v5139_v53 = vld [vmem:[#allocation2 + $0x50] sm:$0xff] }
 0x286   : > { %v5123_v59 = vld [vmem:[#allocation2 + $0x51] sm:$0xff]  ;;  %v3573_v46 = vpack.c.bf16 %v1708_v52, %v1707_v48  ;;  %v1726_v0 = vld [vmem:[%s5791_s3 + $0x288] sm:$0xff]  ;;  %v5145_v61 = vld [vmem:[#allocation2 + $0x60] sm:$0xff] }
 0x287   : > { %v5147_v51 = vld [vmem:[#allocation2 + $0x69] sm:$0xff]  ;;  %v5153_v29 = vld [vmem:[#allocation2 + $0x79] sm:$0xff] }
 0x288   : > { %3540 = vmatpush3.bf16.msra.mxu1 %v3539_v45  ;;  %v1691_v45 = vld [vmem:[%s5791_s3 + $0x170] sm:$0xff]  ;;  %v5151_v35 = vld [vmem:[#allocation2 + $0x68] sm:$0xff]  ;;  %v5171_v7 = vld [vmem:[#allocation2 + $0x99] sm:$0xff] }
 0x289   : > { %3542 = vmatprep.subr.bf16.mxu1 %v3541_v49  ;;  %v1692_v49 = vld [vmem:[%s5791_s3 + $0x178] sm:$0xff]  ;;  %v5169_v3 = vld [vmem:[#allocation2 + $0x90] sm:$0xff]  ;;  %v1709_v15 = vld [vmem:[%s5791_s3 + $0x200] sm:$0xff] }
 0x28a   : > { %v3575_v50 = vpack.c.bf16 %v1692_v49, %v1691_v45  ;;  %v5175_v56 = vld [vmem:[#allocation2 + $0x98] sm:$0xff]  ;;  %v5177_v2 = vld [vmem:[#allocation2 + $0xa9] sm:$0xff]  ;;  %v1729_v16 = vld [vmem:[%s5791_s3 + $0x2a0] sm:$0xff] }
 0x28b   : > { %v1710_v17 = vld [vmem:[%s5791_s3 + $0x208] sm:$0xff]  ;;  %v1727_v20 = vld [vmem:[%s5791_s3 + $0x290] sm:$0xff]  ;;  %v1728_v22 = vld [vmem:[%s5791_s3 + $0x298] sm:$0xff] }
 0x28c   : > { %3544 = vmatpush3.bf16.msra.mxu1 %v3543_v28  ;;  %v5141_v28 = vld [vmem:[#allocation2 + $0x61] sm:$0xff]  ;;  %v3581_v13 = vpack.c.bf16 %v1728_v22, %v1727_v20  ;;  %v1711_v30 = vld [vmem:[%s5791_s3 + $0x210] sm:$0xff]  ;;  %v1712_v14 = vld [vmem:[%s5791_s3 + $0x218] sm:$0xff] }
 0x28d   : > { %3546 = vmatprep.subr.bf16.mxu1 %v3545_v60  ;;  %v3577_v60 = vpack.c.bf16 %v1726_v0, %v1725_v24  ;;  %v1713_v54 = vld [vmem:[%s5791_s3 + $0x220] sm:$0xff]  ;;  %v1714_v55 = vld [vmem:[%s5791_s3 + $0x228] sm:$0xff]  ;;  %v1731_v36 = vld [vmem:[%s5791_s3 + $0x2b0] sm:$0xff] }
 0x28e   : > { %v1715_v1 = vld [vmem:[%s5791_s3 + $0x230] sm:$0xff]  ;;  %v1716_v34 = vld [vmem:[%s5791_s3 + $0x238] sm:$0xff]  ;;  %v1733_v37 = vld [vmem:[%s5791_s3 + $0x2c0] sm:$0xff] }
 0x28f   : > { %1861 = vmatmul.mubr.f32.vlgmr.msra.gmra.mrb[20].mxu1 %v1499_v40  ;;  %v5157_v40 = vld [vmem:[#allocation2 + $0x78] sm:$0xff]  ;;  %v3591_v39 = vpack.c.bf16 %v1716_v34, %v1715_v1  ;;  %v1717_v48 = vld [vmem:[%s5791_s3 + $0x240] sm:$0xff]  ;;  %v1718_v52 = vld [vmem:[%s5791_s3 + $0x248] sm:$0xff] }
 0x290   : > { %3548 = vmatpush3.bf16.msra.mxu1 %v3547_v26  ;;  %1865 = vmatprep.mubr.f32.mxu1 %v1516_v58  ;;  %v5159_v26 = vld [vmem:[#allocation2 + $0x81] sm:$0xff]  ;;  %v5261_v45 = vld [vmem:[#allocation2 + $0x32] sm:$0xff]  ;;  %v3595_v49 = vpack.c.bf16 %v1718_v52, %v1717_v48 }
 0x291   : > { %3550 = vmatprep.subr.bf16.mxu1 %v3549_v5  ;;  %v5163_v58 = vld [vmem:[#allocation2 + $0x80] sm:$0xff]  ;;  %v5165_v5 = vld [vmem:[#allocation2 + $0x91] sm:$0xff]  ;;  %v5341_v48 = vld [vmem:[#allocation2 + $0xc8] sm:$0xff] }
 0x292   : > { %v1719_v0 = vld [vmem:[%s5791_s3 + $0x250] sm:$0xff]  ;;  %v5321_v1 = vld [vmem:[#allocation2 + $0x7a] sm:$0xff]  ;;  %v5325_v34 = vld [vmem:[#allocation2 + $0x82] sm:$0xff] }
 0x293   : > { %1866 = vmatmul.mubr.f32.gmra.mrb[22].mxu1 %v1500_v62  ;;  %v5181_v62 = vld [vmem:[#allocation2 + $0xa8] sm:$0xff]  ;;  %v5345_v52 = vld [vmem:[#allocation2 + $0xb2] sm:$0xff] }
 0x294   : > { %1870 = vmatprep.mubr.f32.mxu1 %v5034_v10  ;;  %3552 = vmatpush3.bf16.msra.mxu1 %v3551_v11  ;;  %v5183_v11 = vld [vmem:[#allocation2 + $0xb1] sm:$0xff] }
 0x295   : > { %3554 = vmatprep.subr.bf16.mxu1 %v3553_v12  ;;  %v5187_v12 = vld [vmem:[#allocation2 + $0xb0] sm:$0xff] }
 0x297   : > { %1871 = vmatmul.mubr.f32.gmra.mrb[24].mxu1 %v5049_v25 }
 0x298   : > { %1875 = vmatprep.mubr.f32.mxu1 %v5051_v32  ;;  %3556 = vmatpush3.bf16.msra.mxu1 %v3555_v27  ;;  %v1531_v27 = vld [vmem:[#allocation2 + $0x2] sm:$0xff] }
 0x299   : > { %3558 = vmatprep.subr.bf16.mxu1 %v3557_v8  ;;  %v3579_v8 = vpack.c.bf16 %v1710_v17, %v1709_v15  ;;  %v1738_v15 = vld [vmem:[%s5791_s3 + $0x2e8] sm:$0xff]  ;;  %v5277_v17 = vld [vmem:[#allocation2 + $0x3a] sm:$0xff] }
 0x29b   : > { %1876 = vmatmul.mubr.f32.gmra.mrb[26].mxu1 %v5067_v18 }
 0x29c   : > { %1880 = vmatprep.mubr.f32.mxu1 %v5069_v38  ;;  %3560 = vmatpush3.bf16.msra.mxu1 %v3559_v19  ;;  %v1730_v19 = vld [vmem:[%s5791_s3 + $0x2a8] sm:$0xff] }
 0x29d   : > { %3562 = vmatprep.subr.bf16.mxu1 %v3561_v21  ;;  %v3583_v21 = vpack.c.bf16 %v1712_v14, %v1711_v30  ;;  %v3585_v23 = vpack.c.bf16 %v1730_v19, %v1729_v16  ;;  %v1740_v30 = vld [vmem:[%s5791_s3 + $0x2f8] sm:$0xff]  ;;  %v5293_v14 = vld [vmem:[#allocation2 + $0x4a] sm:$0xff] }
 0x29f   : > { %1881 = vmatmul.mubr.f32.gmra.mrb[28].mxu1 %v5085_v57 }
 0x2a0   : > { %1885 = vmatprep.mubr.f32.mxu1 %v5087_v6  ;;  %3564 = vmatpush3.bf16.msra.mxu1 %v3563_v4  ;;  %v5229_v4 = vld [vmem:[#allocation2 + $0x1a] sm:$0xff] }
 0x2a1   : > { %3566 = vmatprep.subr.bf16.mxu1 %v3565_v9  ;;  %v3587_v9 = vpack.c.bf16 %v1714_v55, %v1713_v54  ;;  %v1758_v54 = vld [vmem:[%s5791_s3 + $0x388] sm:$0xff]  ;;  %v5309_v55 = vld [vmem:[#allocation2 + $0x52] sm:$0xff] }
 0x2a3   : > { %1886 = vmatmul.mubr.f32.gmra.mrb[30].mxu1 %v5103_v31 }
 0x2a4   : > { %1890 = vmatprep.mubr.f32.mxu1 %v5105_v33  ;;  %3568 = vmatpush3.bf16.msra.mxu1 %v3567_v41  ;;  %v1734_v41 = vld [vmem:[%s5791_s3 + $0x2c8] sm:$0xff] }
 0x2a5   : > { %3570 = vmatprep.subr.bf16.mxu1 %v3569_v44  ;;  %v5245_v44 = vld [vmem:[#allocation2 + $0x22] sm:$0xff]  ;;  %v3593_v63 = vpack.c.bf16 %v1734_v41, %v1733_v37  ;;  %v5329_v37 = vld [vmem:[#allocation2 + $0x92] sm:$0xff]  ;;  %v5333_v41 = vld [vmem:[#allocation2 + $0x9a] sm:$0xff] }
 0x2a7   : > { %1891 = vmatmul.mubr.f32.gmra.mrb[32].mxu1 %v5121_v47 }
 0x2a8   : > { %1895 = vmatprep.mubr.f32.mxu1 %v5123_v59  ;;  %3572 = vmatpush3.bf16.msra.mxu1 %v3571_v42  ;;  %v1735_v42 = vld [vmem:[%s5791_s3 + $0x2d0] sm:$0xff] }
 0x2a9   : > { %3574 = vmatprep.subr.bf16.mxu1 %v3573_v46  ;;  %v1736_v46 = vld [vmem:[%s5791_s3 + $0x2d8] sm:$0xff] }
 0x2aa   : > { %v3597_v24 = vpack.c.bf16 %v1736_v46, %v1735_v42  ;;  %v1741_v42 = vld [vmem:[%s5791_s3 + $0x300] sm:$0xff]  ;;  %v1742_v46 = vld [vmem:[%s5791_s3 + $0x308] sm:$0xff] }
 0x2ab   : > { %1896 = vmatmul.mubr.f32.gmra.mrb[34].mxu1 %v5139_v53 }
 0x2ac   : > { %1900 = vmatprep.mubr.f32.mxu1 %v5141_v28  ;;  %3576 = vmatpush3.bf16.msra.mxu1 %v3575_v50  ;;  %v1720_v50 = vld [vmem:[%s5791_s3 + $0x258] sm:$0xff] }
 0x2ad   : > { %3578 = vmatprep.subr.bf16.mxu1 %v3577_v60  ;;  %v1737_v60 = vld [vmem:[%s5791_s3 + $0x2e0] sm:$0xff]  ;;  %v3599_v20 = vpack.c.bf16 %v1720_v50, %v1719_v0  ;;  %v3611_v0 = vpack.c.bf16 %v1742_v46, %v1741_v42  ;;  %v1767_v42 = vld [vmem:[%s5791_s3 + $0x3d0] sm:$0xff]  ;;  %v1768_v46 = vld [vmem:[%s5791_s3 + $0x3d8] sm:$0xff] }
 0x2ae   : > { %v3601_v22 = vpack.c.bf16 %v1738_v15, %v1737_v60  ;;  %v1743_v60 = vld [vmem:[%s5791_s3 + $0x310] sm:$0xff]  ;;  %v1744_v15 = vld [vmem:[%s5791_s3 + $0x318] sm:$0xff] }
 0x2af   : > { %1901 = vmatmul.mubr.f32.gmra.mrb[36].mxu1 %v5145_v61 }
 0x2b0   : > { %1905 = vmatprep.mubr.f32.mxu1 %v5147_v51 }
 0x2b3   : > { %1906 = vmatmul.mubr.f32.gmra.mrb[38].mxu1 %v5151_v35 }
 0x2b4   : > { %1910 = vmatprep.mubr.f32.mxu1 %v5153_v29 }
 0x2b7   : > { %1911 = vmatmul.mubr.f32.gmra.mrb[40].mxu1 %v5157_v40 }
 0x2b8   : > { %1915 = vmatprep.mubr.f32.mxu1 %v5159_v26 }
 0x2bb   : > { %1916 = vmatmul.mubr.f32.gmra.mrb[42].mxu1 %v5163_v58 }
 0x2bc   : > { %1920 = vmatprep.mubr.f32.mxu1 %v5165_v5 }
 0x2bf   : > { %1921 = vmatmul.mubr.f32.gmra.mrb[44].mxu1 %v5169_v3 }
 0x2c0   : > { %1925 = vmatprep.mubr.f32.mxu1 %v5171_v7 }
 0x2c3   : > { %1926 = vmatmul.mubr.f32.gmra.mrb[46].mxu1 %v5175_v56 }
 0x2c4   : > { %1930 = vmatprep.mubr.f32.mxu1 %v5177_v2 }
 0x2c7   : > { %1931 = vmatmul.mubr.f32.gmra.mrb[48].mxu1 %v5181_v62 }
 0x2c8   : > { %1935 = vmatprep.mubr.f32.mxu1 %v5183_v11 }
 0x2cb   : > { %1936 = vmatmul.mubr.f32.gmra.mrb[50].mxu1 %v5187_v12 }
 0x2cc   : > { %2005 = vmatprep.mubr.f32.mxu1 %v5049_v25  ;;  %v1532_v25 = vld [vmem:[#allocation2 + $0xa] sm:$0xff] }
 0x2cf   : > { %2006 = vmatmul.mubr.f32.vlgmr.msra.gmra.mrb[52].mxu1 %v1531_v27  ;;  %v1721_v27 = vld [vmem:[%s5791_s3 + $0x260] sm:$0xff] }
 0x2d0   : > { %3580 = vmatpush3.bf16.msra.mxu1 %v3579_v8  ;;  %2010 = vmatprep.mubr.f32.mxu1 %v5067_v18  ;;  %v1732_v18 = vld [vmem:[%s5791_s3 + $0x2b8] sm:$0xff]  ;;  %v1722_v8 = vld [vmem:[%s5791_s3 + $0x268] sm:$0xff] }
 0x2d1   : > { %3582 = vmatprep.subr.bf16.mxu1 %v3581_v13  ;;  %v3589_v43 = vpack.c.bf16 %v1732_v18, %v1731_v36  ;;  %v1739_v13 = vld [vmem:[%s5791_s3 + $0x2f0] sm:$0xff]  ;;  %v3603_v16 = vpack.c.bf16 %v1722_v8, %v1721_v27  ;;  %v1745_v8 = vld [vmem:[%s5791_s3 + $0x320] sm:$0xff] }
 0x2d2   : > { %v3605_v19 = vpack.c.bf16 %v1740_v30, %v1739_v13  ;;  %v1746_v13 = vld [vmem:[%s5791_s3 + $0x328] sm:$0xff]  ;;  %v1763_v30 = vld [vmem:[%s5791_s3 + $0x3b0] sm:$0xff] }
 0x2d3   : > { %2011 = vmatmul.mubr.f32.gmra.mrb[54].mxu1 %v1532_v25  ;;  %v1723_v25 = vld [vmem:[%s5791_s3 + $0x270] sm:$0xff] }
 0x2d4   : > { %2015 = vmatprep.mubr.f32.mxu1 %v5085_v57  ;;  %3584 = vmatpush3.bf16.msra.mxu1 %v3583_v21  ;;  %v1724_v21 = vld [vmem:[%s5791_s3 + $0x278] sm:$0xff] }
 0x2d5   : > { %3586 = vmatprep.subr.bf16.mxu1 %v3585_v23  ;;  %v1757_v23 = vld [vmem:[%s5791_s3 + $0x380] sm:$0xff]  ;;  %v3607_v36 = vpack.c.bf16 %v1724_v21, %v1723_v25  ;;  %v1748_v25 = vld [vmem:[%s5791_s3 + $0x338] sm:$0xff] }
 0x2d6   : > { %v3609_v18 = vpack.c.bf16 %v1758_v54, %v1757_v23  ;;  %v1765_v21 = vld [vmem:[%s5791_s3 + $0x3c0] sm:$0xff] }
 0x2d7   : > { %2016 = vmatmul.mubr.f32.gmra.mrb[56].mxu1 %v5229_v4 }
 0x2d8   : > { %2020 = vmatprep.mubr.f32.mxu1 %v5103_v31  ;;  %3588 = vmatpush3.bf16.msra.mxu1 %v3587_v9  ;;  %v5313_v9 = vld [vmem:[#allocation2 + $0x62] sm:$0xff] }
 0x2d9   : > { %3590 = vmatprep.subr.bf16.mxu1 %v3589_v43  ;;  %v5317_v43 = vld [vmem:[#allocation2 + $0x6a] sm:$0xff] }
 0x2db   : > { %2021 = vmatmul.mubr.f32.gmra.mrb[58].mxu1 %v5245_v44 }
 0x2dc   : > { %2025 = vmatprep.mubr.f32.mxu1 %v5121_v47  ;;  %3592 = vmatpush3.bf16.msra.mxu1 %v3591_v39  ;;  %v5335_v39 = vld [vmem:[#allocation2 + $0xc0] sm:$0xff] }
 0x2dd   : > { %3594 = vmatprep.subr.bf16.mxu1 %v3593_v63  ;;  %v5339_v63 = vld [vmem:[#allocation2 + $0xaa] sm:$0xff] }
 0x2df   : > { %2026 = vmatmul.mubr.f32.gmra.mrb[60].mxu1 %v5261_v45 }
 0x2e0   : > { %2030 = vmatprep.mubr.f32.mxu1 %v5139_v53  ;;  %3596 = vmatpush3.bf16.msra.mxu1 %v3595_v49  ;;  %v1759_v49 = vld [vmem:[%s5791_s3 + $0x390] sm:$0xff] }
 0x2e1   : > { %3598 = vmatprep.subr.bf16.mxu1 %v3597_v24  ;;  %v1760_v24 = vld [vmem:[%s5791_s3 + $0x398] sm:$0xff] }
 0x2e2   : > { %v3613_v50 = vpack.c.bf16 %v1760_v24, %v1759_v49  ;;  %v3629_v24 = vpack.c.bf16 %v1768_v46, %v1767_v42  ;;  %v1775_v42 = vld [vmem:[%s5791_s3 + $0x410] sm:$0xff]  ;;  %v1776_v46 = vld [vmem:[%s5791_s3 + $0x418] sm:$0xff] }
 0x2e3   : > { %2031 = vmatmul.mubr.f32.gmra.mrb[62].mxu1 %v5277_v17 }
 0x2e4   : > { %2035 = vmatprep.mubr.f32.mxu1 %v5145_v61  ;;  %3600 = vmatpush3.bf16.msra.mxu1 %v3599_v20  ;;  %v1761_v20 = vld [vmem:[%s5791_s3 + $0x3a0] sm:$0xff] }
 0x2e5   : > { %3602 = vmatprep.subr.bf16.mxu1 %v3601_v22  ;;  %v1762_v22 = vld [vmem:[%s5791_s3 + $0x3a8] sm:$0xff] }
 0x2e6   : > { %v3617_v27 = vpack.c.bf16 %v1762_v22, %v1761_v20 }
 0x2e7   : > { %2036 = vmatmul.mubr.f32.gmra.mrb[64].mxu1 %v5293_v14 }
 0x2e8   : > { %2040 = vmatprep.mubr.f32.mxu1 %v5151_v35  ;;  %3604 = vmatpush3.bf16.msra.mxu1 %v3603_v16 }
 0x2e9   : > { %3606 = vmatprep.subr.bf16.mxu1 %v3605_v19  ;;  %v1747_v19 = vld [vmem:[%s5791_s3 + $0x330] sm:$0xff] }
 0x2ea   : > { %v3623_v23 = vpack.c.bf16 %v1748_v25, %v1747_v19  ;;  %v1773_v19 = vld [vmem:[%s5791_s3 + $0x400] sm:$0xff]  ;;  %v1774_v25 = vld [vmem:[%s5791_s3 + $0x408] sm:$0xff] }
 0x2eb   : > { %2041 = vmatmul.mubr.f32.gmra.mrb[66].mxu1 %v5309_v55 }
 0x2ec   : > { %2045 = vmatprep.mubr.f32.mxu1 %v5157_v40  ;;  %3608 = vmatpush3.bf16.msra.mxu1 %v3607_v36  ;;  %v1749_v36 = vld [vmem:[%s5791_s3 + $0x340] sm:$0xff] }
 0x2ed   : > { %3610 = vmatprep.subr.bf16.mxu1 %v3609_v18  ;;  %v1750_v18 = vld [vmem:[%s5791_s3 + $0x348] sm:$0xff] }
 0x2ee   : > { %v3627_v49 = vpack.c.bf16 %v1750_v18, %v1749_v36  ;;  %v5477_v36 = vld [vmem:[#allocation2 + $0xca] sm:$0xff] }
 0x2ef   : > { %2046 = vmatmul.mubr.f32.gmra.mrb[68].mxu1 %v5313_v9  ;;  %v5481_v18 = vld [vmem:[#allocation2 + $0xc9] sm:$0xff] }
 0x2f0   : > { %2050 = vmatprep.mubr.f32.mxu1 %v5163_v58 }
 0x2f3   : > { %2051 = vmatmul.mubr.f32.gmra.mrb[70].mxu1 %v5317_v43 }
 0x2f4   : > { %2055 = vmatprep.mubr.f32.mxu1 %v5169_v3 }
 0x2f7   : > { %2056 = vmatmul.mubr.f32.gmra.mrb[72].mxu1 %v5321_v1 }
 0x2f8   : > { %2060 = vmatprep.mubr.f32.mxu1 %v5175_v56 }
 0x2fb   : > { %2061 = vmatmul.mubr.f32.gmra.mrb[74].mxu1 %v5325_v34 }
 0x2fc   : > { %2065 = vmatprep.mubr.f32.mxu1 %v5181_v62 }
 0x2ff   : > { %2066 = vmatmul.mubr.f32.gmra.mrb[76].mxu1 %v5329_v37 }
 0x300   : > { %2070 = vmatprep.mubr.f32.mxu1 %v5187_v12 }
 0x303   : > { %2071 = vmatmul.mubr.f32.gmra.mrb[78].mxu1 %v5333_v41 }
 0x304   : > { %2075 = vmatprep.mubr.f32.mxu1 %v5335_v39 }
 0x307   : > { %2076 = vmatmul.mubr.f32.gmra.mrb[80].mxu1 %v5339_v63 }
 0x308   : > { %2080 = vmatprep.mubr.f32.mxu1 %v5341_v48 }
 0x30b   : > { %2081 = vmatmul.mubr.f32.gmra.mrb[82].mxu1 %v5345_v52 }
 0x30c   : > { %2150 = vmatprep.mubr.f32.mxu1 %v5229_v4  ;;  %v3615_v4 = vpack.c.bf16 %v1744_v15, %v1743_v60  ;;  %v1769_v60 = vld [vmem:[%s5791_s3 + $0x3e0] sm:$0xff]  ;;  %v1770_v15 = vld [vmem:[%s5791_s3 + $0x3e8] sm:$0xff] }
 0x30d   : > { %v3633_v22 = vpack.c.bf16 %v1770_v15, %v1769_v60  ;;  %v1780_v60 = vld [vmem:[%s5791_s3 + $0x438] sm:$0xff]  ;;  %v1782_v15 = vld [vmem:[%s5791_s3 + $0x448] sm:$0xff] }
 0x30f   : > { %2151 = vmatmul.mubr.f32.vlgmr.msra.gmra.mrb[84].mxu1 %v5034_v10  ;;  %v1764_v10 = vld [vmem:[%s5791_s3 + $0x3b8] sm:$0xff] }
 0x310   : > { %3612 = vmatpush3.bf16.msra.mxu1 %v3611_v0  ;;  %2155 = vmatprep.mubr.f32.mxu1 %v5245_v44  ;;  %v3619_v44 = vpack.c.bf16 %v1746_v13, %v1745_v8  ;;  %v3621_v16 = vpack.c.bf16 %v1764_v10, %v1763_v30  ;;  %v1751_v0 = vld [vmem:[%s5791_s3 + $0x350] sm:$0xff]  ;;  %v1772_v13 = vld [vmem:[%s5791_s3 + $0x3f8] sm:$0xff] }
 0x311   : > { %3614 = vmatprep.subr.bf16.mxu1 %v3613_v50  ;;  %v1752_v50 = vld [vmem:[%s5791_s3 + $0x358] sm:$0xff]  ;;  %v1771_v8 = vld [vmem:[%s5791_s3 + $0x3f0] sm:$0xff] }
 0x312   : > { %v3631_v20 = vpack.c.bf16 %v1752_v50, %v1751_v0  ;;  %v3637_v10 = vpack.c.bf16 %v1772_v13, %v1771_v8  ;;  %v1778_v0 = vld [vmem:[%s5791_s3 + $0x428] sm:$0xff] }
 0x313   : > { %2156 = vmatmul.mubr.f32.gmra.mrb[86].mxu1 %v5051_v32  ;;  %v1766_v32 = vld [vmem:[%s5791_s3 + $0x3c8] sm:$0xff] }
 0x314   : > { %2160 = vmatprep.mubr.f32.mxu1 %v5261_v45  ;;  %3616 = vmatpush3.bf16.msra.mxu1 %v3615_v4  ;;  %v3625_v54 = vpack.c.bf16 %v1766_v32, %v1765_v21  ;;  %v1753_v4 = vld [vmem:[%s5791_s3 + $0x360] sm:$0xff]  ;;  %v3641_v32 = vpack.c.bf16 %v1774_v25, %v1773_v19 }
 0x315   : > { %3618 = vmatprep.subr.bf16.mxu1 %v3617_v27  ;;  %v1754_v27 = vld [vmem:[%s5791_s3 + $0x368] sm:$0xff] }
 0x316   : > { %v3635_v30 = vpack.c.bf16 %v1754_v27, %v1753_v4  ;;  %v1788_v27 = vld [vmem:[%s5791_s3 + $0x478] sm:$0xff] }
 0x317   : > { %2161 = vmatmul.mubr.f32.gmra.mrb[88].mxu1 %v5069_v38 }
 0x318   : > { %2165 = vmatprep.mubr.f32.mxu1 %v5277_v17  ;;  %3620 = vmatpush3.bf16.msra.mxu1 %v3619_v44  ;;  %v1755_v44 = vld [vmem:[%s5791_s3 + $0x370] sm:$0xff] }
 0x319   : > { %3622 = vmatprep.subr.bf16.mxu1 %v3621_v16  ;;  %v1756_v16 = vld [vmem:[%s5791_s3 + $0x378] sm:$0xff] }
 0x31a   : > { %v3639_v21 = vpack.c.bf16 %v1756_v16, %v1755_v44 }
 0x31b   : > { %2166 = vmatmul.mubr.f32.gmra.mrb[90].mxu1 %v5087_v6 }
 0x31c   : > { %2170 = vmatprep.mubr.f32.mxu1 %v5293_v14  ;;  %3624 = vmatpush3.bf16.msra.mxu1 %v3623_v23  ;;  %v5471_v23 = vld [vmem:[#allocation2 + $0xc2] sm:$0xff] }
 0x31d   : > { %3626 = vmatprep.subr.bf16.mxu1 %v3625_v54  ;;  %v5475_v54 = vld [vmem:[#allocation2 + $0xc1] sm:$0xff] }
 0x31f   : > { %2171 = vmatmul.mubr.f32.gmra.mrb[92].mxu1 %v5105_v33 }
 0x320   : > { %2175 = vmatprep.mubr.f32.mxu1 %v5309_v55  ;;  %3628 = vmatpush3.bf16.msra.mxu1 %v3627_v49  ;;  %v3645_v49 = vpack.c.bf16 %v1776_v46, %v1775_v42 }
 0x321   : > { %3630 = vmatprep.subr.bf16.mxu1 %v3629_v24  ;;  %v1777_v24 = vld [vmem:[%s5791_s3 + $0x420] sm:$0xff] }
 0x322   : > { %v3649_v50 = vpack.c.bf16 %v1778_v0, %v1777_v24  ;;  %v1628_v0 = vld [vmem:[#allocation2 + $0xe1] sm:$0xff] }
 0x323   : > { %2176 = vmatmul.mubr.f32.gmra.mrb[94].mxu1 %v5123_v59 }
 0x324   : > { %2180 = vmatprep.mubr.f32.mxu1 %v5313_v9  ;;  %3632 = vmatpush3.bf16.msra.mxu1 %v3631_v20  ;;  %v1784_v20 = vld [vmem:[%s5791_s3 + $0x458] sm:$0xff] }
 0x325   : > { %3634 = vmatprep.subr.bf16.mxu1 %v3633_v22  ;;  %v1786_v22 = vld [vmem:[%s5791_s3 + $0x468] sm:$0xff] }
 0x327   : > { %2181 = vmatmul.mubr.f32.gmra.mrb[96].mxu1 %v5141_v28 }
 0x328   : > { %2185 = vmatprep.mubr.f32.mxu1 %v5317_v43  ;;  %3636 = vmatpush3.bf16.msra.mxu1 %v3635_v30 }
 0x329   : > { %3638 = vmatprep.subr.bf16.mxu1 %v3637_v10 }
 0x32b   : > { %2186 = vmatmul.mubr.f32.gmra.mrb[98].mxu1 %v5147_v51 }
 0x32c   : > { %2190 = vmatprep.mubr.f32.mxu1 %v5321_v1  ;;  %3640 = vmatpush3.bf16.msra.mxu1 %v3639_v21 }
 0x32d   : > { %3642 = vmatprep.subr.bf16.mxu1 %v3641_v32 }
 0x32f   : > { %2191 = vmatmul.mubr.f32.gmra.mrb[100].mxu1 %v5153_v29 }
 0x330   : > { %2195 = vmatprep.mubr.f32.mxu1 %v5325_v34 }
 0x333   : > { %2196 = vmatmul.mubr.f32.gmra.mrb[102].mxu1 %v5159_v26 }
 0x334   : > { %2200 = vmatprep.mubr.f32.mxu1 %v5329_v37 }
 0x337   : > { %2201 = vmatmul.mubr.f32.gmra.mrb[104].mxu1 %v5165_v5 }
 0x338   : > { %2205 = vmatprep.mubr.f32.mxu1 %v5333_v41 }
 0x33b   : > { %2206 = vmatmul.mubr.f32.gmra.mrb[106].mxu1 %v5171_v7 }
 0x33c   : > { %2210 = vmatprep.mubr.f32.mxu1 %v5339_v63 }
 0x33f   : > { %2211 = vmatmul.mubr.f32.gmra.mrb[108].mxu1 %v5177_v2 }
 0x340   : > { %2215 = vmatprep.mubr.f32.mxu1 %v5345_v52 }
 0x343   : > { %2216 = vmatmul.mubr.f32.gmra.mrb[110].mxu1 %v5183_v11 }
 0x344   : > { %2220 = vmatprep.mubr.f32.mxu1 %v5471_v23 }
 0x347   : > { %2221 = vmatmul.mubr.f32.gmra.mrb[112].mxu1 %v5475_v54 }
 0x348   : > { %2225 = vmatprep.mubr.f32.mxu1 %v5477_v36 }
 0x34b   : > { %2226 = vmatmul.mubr.f32.gmra.mrb[114].mxu1 %v5481_v18 }
 0x34c   : > { %2295 = vmatprep.mubr.f32.mxu1 %v5069_v38  ;;  %v1779_v38 = vld [vmem:[%s5791_s3 + $0x430] sm:$0xff] }
 0x34f   : > { %2296 = vmatmul.mubr.f32.vlgmr.msra.gmra.mrb[116].mxu1 %v5085_v57  ;;  %v3653_v57 = vpack.c.bf16 %v1780_v60, %v1779_v38 }
 0x350   : > { %3644 = vmatpush3.bf16.msra.mxu1 %v3641_v32  ;;  %2300 = vmatprep.mubr.f32.mxu1 %v5087_v6  ;;  %v1781_v6 = vld [vmem:[%s5791_s3 + $0x440] sm:$0xff] }
 0x351   : > { %3646 = vmatprep.subr.bf16.mxu1 %v3645_v49 }
 0x353   : > { %2301 = vmatmul.mubr.f32.gmra.mrb[118].mxu1 %v5103_v31  ;;  %v3657_v31 = vpack.c.bf16 %v1782_v15, %v1781_v6 }
 0x354   : > { %2305 = vmatprep.mubr.f32.mxu1 %v5105_v33  ;;  %3648 = vmatpush3.bf16.msra.mxu1 %v3645_v49  ;;  %v1783_v33 = vld [vmem:[%s5791_s3 + $0x450] sm:$0xff] }
 0x355   : > { %3650 = vmatprep.subr.bf16.mxu1 %v3649_v50 }
 0x357   : > { %2306 = vmatmul.mubr.f32.gmra.mrb[120].mxu1 %v5121_v47  ;;  %v3661_v47 = vpack.c.bf16 %v1784_v20, %v1783_v33 }
 0x358   : > { %2310 = vmatprep.mubr.f32.mxu1 %v5123_v59  ;;  %3652 = vmatpush3.bf16.msra.mxu1 %v3649_v50  ;;  %v1785_v59 = vld [vmem:[%s5791_s3 + $0x460] sm:$0xff] }
 0x359   : > { %3654 = vmatprep.subr.bf16.mxu1 %v3653_v57 }
 0x35b   : > { %2311 = vmatmul.mubr.f32.gmra.mrb[122].mxu1 %v5139_v53  ;;  %v3665_v53 = vpack.c.bf16 %v1786_v22, %v1785_v59 }
 0x35c   : > { %2315 = vmatprep.mubr.f32.mxu1 %v5141_v28  ;;  %3656 = vmatpush3.bf16.msra.mxu1 %v3653_v57  ;;  %v1787_v28 = vld [vmem:[%s5791_s3 + $0x470] sm:$0xff] }
 0x35d   : > { %3658 = vmatprep.subr.bf16.mxu1 %v3657_v31 }
 0x35f   : > { %2316 = vmatmul.mubr.f32.gmra.mrb[124].mxu1 %v5145_v61  ;;  %v3669_v61 = vpack.c.bf16 %v1788_v27, %v1787_v28 }
 0x360   : > { %2320 = vmatprep.mubr.f32.mxu1 %v5147_v51  ;;  %3660 = vmatpush3.bf16.msra.mxu1 %v3657_v31 }
 0x361   : > { %3662 = vmatprep.subr.bf16.mxu1 %v3661_v47 }
 0x362   : > { %v2851_v4 = vpop.f32.mrb[20].mxu1 }
 0x363   : > { %v2852_v8 = vpop.f32.mrb[21].mxu1  ;;  %2321 = vmatmul.mubr.f32.gmra.mrb[126].mxu1 %v5151_v35 }
 0x364   : > { %v5538_v13 = vadd.f32 %v2852_v8, %v2851_v4  ;;  %2325 = vmatprep.mubr.f32.mxu1 %v5153_v29  ;;  %3664 = vmatpush3.bf16.msra.mxu1 %v3661_v47 }
 0x365   : > { %3666 = vmatprep.subr.bf16.mxu1 %v3665_v53 }
 0x366   : > { %v2854_v51 = vpop.f32.mrb[22].mxu1 }
 0x367   : > { %v2855_v30 = vpop.f32.mrb[23].mxu1  ;;  %2326 = vmatmul.mubr.f32.gmra.mrb[128].mxu1 %v5157_v40 }
 0x368   : > { %v5542_v10 = vadd.f32 %v2855_v30, %v2854_v51  ;;  %2330 = vmatprep.mubr.f32.mxu1 %v5159_v26  ;;  %3668 = vmatpush3.bf16.msra.mxu1 %v3665_v53  ;;  %v1644_v51 = vld [vmem:[#allocation2 + $0xe2] sm:$0xff] }
 0x369   : > { %3670 = vmatprep.subr.bf16.mxu1 %v3669_v61 }
 0x36a   : > { %v2857_v44 = vpop.f32.mrb[24].mxu1 }
 0x36b   : > { %v2858_v16 = vpop.f32.mrb[25].mxu1  ;;  %2331 = vmatmul.mubr.f32.gmra.mrb[130].mxu1 %v5163_v58 }
 0x36c   : > { %v5546_v35 = vadd.f32 %v2858_v16, %v2857_v44  ;;  %2335 = vmatprep.mubr.f32.mxu1 %v5165_v5  ;;  %3672 = vmatpush3.bf16.msra.mxu1 %v3669_v61 }
 0x36e   : > { %v2860_v29 = vpop.f32.mrb[26].mxu1 }
 0x36f   : > { %v2861_v19 = vpop.f32.mrb[27].mxu1  ;;  %2336 = vmatmul.mubr.f32.gmra.mrb[132].mxu1 %v5169_v3 }
 0x370   : > { %v5550_v40 = vadd.f32 %v2861_v19, %v2860_v29  ;;  %2340 = vmatprep.mubr.f32.mxu1 %v5171_v7 }
 0x372   : > { %v2863_v26 = vpop.f32.mrb[28].mxu1 }
 0x373   : > { %v2864_v25 = vpop.f32.mrb[29].mxu1  ;;  %2341 = vmatmul.mubr.f32.gmra.mrb[134].mxu1 %v5175_v56 }
 0x374   : > { %v5554_v21 = vadd.f32 %v2864_v25, %v2863_v26  ;;  %2345 = vmatprep.mubr.f32.mxu1 %v5177_v2 }
 0x376   : > { %v2866_v58 = vpop.f32.mrb[30].mxu1 }
 0x377   : > { %v2867_v32 = vpop.f32.mrb[31].mxu1  ;;  %2346 = vmatmul.mubr.f32.gmra.mrb[136].mxu1 %v5181_v62  ;;  %v1627_v62 = vld [vmem:[#allocation2 + $0xd9] sm:$0xff] }
 0x378   : > { %v5558_v5 = vadd.f32 %v2867_v32, %v2866_v58  ;;  %2350 = vmatprep.mubr.f32.mxu1 %v5183_v11 }
 0x37a   : > { %v2869_v3 = vpop.f32.mrb[32].mxu1 }
 0x37b   : > { %v2870_v42 = vpop.f32.mrb[33].mxu1  ;;  %2351 = vmatmul.mubr.f32.gmra.mrb[138].mxu1 %v5187_v12  ;;  %v1611_v12 = vld [vmem:[#allocation2 + $0xd8] sm:$0xff] }
 0x37c   : > { %v5562_v7 = vadd.f32 %v2870_v42, %v2869_v3  ;;  %2355 = vmatprep.mubr.f32.mxu1 %v5475_v54 }
 0x37e   : > { %v2872_v56 = vpop.f32.mrb[34].mxu1 }
 0x37f   : > { %v2873_v46 = vpop.f32.mrb[35].mxu1  ;;  %2356 = vmatmul.mubr.f32.gmra.mrb[140].mxu1 %v5335_v39  ;;  %v1612_v39 = vld [vmem:[#allocation2 + $0xe0] sm:$0xff] }
 0x380   : > { %v5566_v2 = vadd.f32 %v2873_v46, %v2872_v56  ;;  %2360 = vmatprep.mubr.f32.mxu1 %v5481_v18 }
 0x382   : > { %v2875_v49 = vpop.f32.mrb[36].mxu1 }
 0x383   : > { %v2876_v24 = vpop.f32.mrb[37].mxu1  ;;  %2361 = vmatmul.mubr.f32.gmra.mrb[142].mxu1 %v5341_v48 }
 0x384   : > { %v5570_v11 = vadd.f32 %v2876_v24, %v2875_v49  ;;  %2365 = vmatprep.mubr.f32.mxu1 %v1627_v62 }
 0x386   : > { %v2878_v50 = vpop.f32.mrb[38].mxu1 }
 0x387   : > { %v2879_v54 = vpop.f32.mrb[39].mxu1  ;;  %2366 = vmatmul.mubr.f32.gmra.mrb[144].mxu1 %v1611_v12 }
 0x388   : > { %v5572_v38 = vadd.f32 %v2879_v54, %v2878_v50  ;;  %2370 = vmatprep.mubr.f32.mxu1 %v1628_v0 }
 0x38a   : > { %v2881_v60 = vpop.f32.mrb[40].mxu1 }
 0x38b   : > { %v2882_v57 = vpop.f32.mrb[41].mxu1  ;;  %2371 = vmatmul.mubr.f32.gmra.mrb[146].mxu1 %v1612_v39 }
 0x38c   : > { %v5574_v18 = vadd.f32 %v2882_v57, %v2881_v60  ;;  %3265 = vmatprep.mubr.f32.mxu1 %v5261_v45 }
 0x38e   : > { %v2884_v48 = vpop.f32.mrb[42].mxu1 }
 0x38f   : > { %v2885_v6 = vpop.f32.mrb[43].mxu1  ;;  %3266 = vmatmul.mubr.f32.vlgmr.msra.gmra.mrb[148].mxu1 %v5277_v17 }
 0x390   : > { %v5578_v15 = vadd.f32 %v2885_v6, %v2884_v48  ;;  %3268 = vmatprep.mubr.f32.mxu1 %v5293_v14 }
 0x392   : > { %v2887_v31 = vpop.f32.mrb[44].mxu1 }
 0x393   : > { %v2888_v33 = vpop.f32.mrb[45].mxu1  ;;  %3269 = vmatmul.mubr.f32.gmra.mrb[150].mxu1 %v5309_v55 }
 0x394   : > { %v5582_v20 = vadd.f32 %v2888_v33, %v2887_v31  ;;  %3271 = vmatprep.mubr.f32.mxu1 %v5313_v9 }
 0x396   : > { %v2890_v47 = vpop.f32.mrb[46].mxu1 }
 0x397   : > { %v2891_v59 = vpop.f32.mrb[47].mxu1  ;;  %3272 = vmatmul.mubr.f32.gmra.mrb[152].mxu1 %v5317_v43  ;;  %v5600_v43 = vld [vmem:[%s5792_s4] ss:$0 sm:$0xff] }
 0x398   : > { %v5586_v45 = vadd.f32 %v2891_v59, %v2890_v47  ;;  %3274 = vmatprep.mubr.f32.mxu1 %v5321_v1  ;;  %v1868_v8 = vadd.f32 %v5542_v10, %v5600_v43  ;;  %v1883_v32 = vadd.f32 %v5554_v21, %v5600_v43  ;;  %v1888_v46 = vadd.f32 %v5558_v5, %v5600_v43 }
 0x399   : > { %v1893_v12 = vadd.f32 %v5562_v7, %v5600_v43  ;;  %v1898_v39 = vadd.f32 %v5566_v2, %v5600_v43  ;;  %v1903_v6 = vadd.f32 %v5570_v11, %v5600_v43  ;;  %v1908_v59 = vadd.f32 %v5572_v38, %v5600_v43 }
 0x39a   : > { %v2893_v17 = vpop.f32.mrb[48].mxu1 }
 0x39b   : > { %v2894_v22 = vpop.f32.mrb[49].mxu1  ;;  %3275 = vmatmul.mubr.f32.gmra.mrb[154].mxu1 %v5325_v34  ;;  %v1863_v34 = vadd.f32 %v5538_v13, %v5600_v43 }
 0x39c   : > { %v5590_v14 = vadd.f32 %v2894_v22, %v2893_v17  ;;  %3277 = vmatprep.mubr.f32.mxu1 %v5329_v37 }
 0x39e   : > { %v2896_v55 = vpop.f32.mrb[50].mxu1 }
 0x39f   : > { %v2897_v53 = vpop.f32.mrb[51].mxu1  ;;  %3278 = vmatmul.mubr.f32.gmra.mrb[156].mxu1 %v5333_v41  ;;  %v1643_v41 = vld [vmem:[#allocation2 + $0xda] sm:$0xff] }
 0x3a0   : > { %v5594_v9 = vadd.f32 %v2897_v53, %v2896_v55  ;;  %3280 = vmatprep.mubr.f32.mxu1 %v5339_v63  ;;  %v1913_v53 = vadd.f32 %v5574_v18, %v5600_v43 }
 0x3a2   : > { %v2931_v1 = vpop.f32.mrb[52].mxu1 }
 0x3a3   : > { %v2932_v4 = vpop.f32.mrb[53].mxu1  ;;  %3281 = vmatmul.mubr.f32.gmra.mrb[158].mxu1 %v5345_v52 }
 0x3a4   : > { %v2933_v37 = vadd.f32 %v2932_v4, %v2931_v1  ;;  %3283 = vmatprep.mubr.f32.mxu1 %v5471_v23  ;;  %v1873_v23 = vadd.f32 %v5546_v35, %v5600_v43 }
 0x3a6   : > { %v5606_v28 = vadd.f32 %v2933_v37, %v1863_v34  ;;  %v2934_v27 = vpop.f32.mrb[54].mxu1  ;;  %v1918_v37 = vadd.f32 %v5578_v15, %v5600_v43 }
 0x3a7   : > { %v2935_v63 = vpop.f32.mrb[55].mxu1  ;;  %3284 = vmatmul.mubr.f32.gmra.mrb[160].mxu1 %v5477_v36  ;;  %v1878_v36 = vadd.f32 %v5550_v40, %v5600_v43 }
 0x3a8   : > { %v2936_v61 = vadd.f32 %v2935_v63, %v2934_v27  ;;  %3286 = vmatprep.mubr.f32.mxu1 %v1643_v41 }
 0x3aa   : > { %v5611_v52 = vadd.f32 %v2936_v61, %v1868_v8  ;;  %v2937_v30 = vpop.f32.mrb[56].mxu1  ;;  %v1923_v8 = vadd.f32 %v5582_v20, %v5600_v43 }
 0x3ab   : > { %v2938_v13 = vpop.f32.mrb[57].mxu1  ;;  %3287 = vmatmul.mubr.f32.gmra.mrb[162].mxu1 %v1644_v51 }
 0x3ac   : > { %v2939_v44 = vadd.f32 %v2938_v13, %v2937_v30  ;;  %v1928_v13 = vadd.f32 %v5586_v45, %v5600_v43 }
 0x3ae   : > { %v5615_v16 = vadd.f32 %v2939_v44, %v1873_v23  ;;  %v2940_v29 = vpop.f32.mrb[58].mxu1 }
 0x3af   : > { %v2941_v19 = vpop.f32.mrb[59].mxu1 }
 0x3b0   : > { %v2942_v10 = vadd.f32 %v2941_v19, %v2940_v29  ;;  %v1933_v19 = vadd.f32 %v5590_v14, %v5600_v43 }
 0x3b2   : > { %v5619_v26 = vadd.f32 %v2942_v10, %v1878_v36  ;;  %v2943_v25 = vpop.f32.mrb[60].mxu1 }
 0x3b3   : > { %v2944_v58 = vpop.f32.mrb[61].mxu1 }
 0x3b4   : > { %v2945_v3 = vadd.f32 %v2944_v58, %v2943_v25  ;;  %v1938_v58 = vadd.f32 %v5594_v9, %v5600_v43 }
 0x3b6   : > { %v5623_v42 = vadd.f32 %v2945_v3, %v1883_v32  ;;  %v2946_v35 = vpop.f32.mrb[62].mxu1 }
 0x3b7   : > { %v2947_v56 = vpop.f32.mrb[63].mxu1 }
 0x3b8   : > { %v2948_v62 = vadd.f32 %v2947_v56, %v2946_v35 }
 0x3ba   : > { %v5627_v49 = vadd.f32 %v2948_v62, %v1888_v46  ;;  %v2949_v40 = vpop.f32.mrb[64].mxu1 }
 0x3bb   : > { %v2950_v24 = vpop.f32.mrb[65].mxu1 }
 0x3bc   : > { %v2951_v0 = vadd.f32 %v2950_v24, %v2949_v40 }
 0x3be   : > { %v5631_v50 = vadd.f32 %v2951_v0, %v1893_v12  ;;  %v2952_v21 = vpop.f32.mrb[66].mxu1 }
 0x3bf   : > { %v2953_v54 = vpop.f32.mrb[67].mxu1 }
 0x3c0   : > { %v2954_v60 = vadd.f32 %v2953_v54, %v2952_v21 }
 0x3c2   : > { %v5635_v57 = vadd.f32 %v2954_v60, %v1898_v39  ;;  %v2955_v5 = vpop.f32.mrb[68].mxu1 }
 0x3c3   : > { %v2956_v48 = vpop.f32.mrb[69].mxu1 }
 0x3c4   : > { %v2957_v31 = vadd.f32 %v2956_v48, %v2955_v5 }
 0x3c6   : > { %v5639_v33 = vadd.f32 %v2957_v31, %v1903_v6  ;;  %v2958_v7 = vpop.f32.mrb[70].mxu1 }
 0x3c7   : > { %v2959_v47 = vpop.f32.mrb[71].mxu1 }
 0x3c8   : > { %v2960_v17 = vadd.f32 %v2959_v47, %v2958_v7 }
 0x3ca   : > { %v5643_v22 = vadd.f32 %v2960_v17, %v1908_v59  ;;  %v2961_v2 = vpop.f32.mrb[72].mxu1 }
 0x3cb   : > { %v2962_v55 = vpop.f32.mrb[73].mxu1 }
 0x3cc   : > { %v2963_v1 = vadd.f32 %v2962_v55, %v2961_v2 }
 0x3ce   : > { %v5647_v4 = vadd.f32 %v2963_v1, %v1913_v53  ;;  %v2964_v11 = vpop.f32.mrb[74].mxu1 }
 0x3cf   : > { %v2965_v34 = vpop.f32.mrb[75].mxu1 }
 0x3d0   : > { %v2966_v41 = vadd.f32 %v2965_v34, %v2964_v11 }
 0x3d2   : > { %v5651_v27 = vadd.f32 %v2966_v41, %v1918_v37  ;;  %v2967_v38 = vpop.f32.mrb[76].mxu1 }
 0x3d3   : > { %v2968_v63 = vpop.f32.mrb[77].mxu1 }
 0x3d4   : > { %v2969_v61 = vadd.f32 %v2968_v63, %v2967_v38 }
 0x3d6   : > { %v5655_v51 = vadd.f32 %v2969_v61, %v1923_v8  ;;  %v2970_v18 = vpop.f32.mrb[78].mxu1 }
 0x3d7   : > { %v2971_v30 = vpop.f32.mrb[79].mxu1 }
 0x3d8   : > { %v2972_v23 = vadd.f32 %v2971_v30, %v2970_v18 }
 0x3da   : > { %v5659_v44 = vadd.f32 %v2972_v23, %v1928_v13  ;;  %v2973_v15 = vpop.f32.mrb[80].mxu1 }
 0x3db   : > { %v2974_v29 = vpop.f32.mrb[81].mxu1 }
 0x3dc   : > { %v2975_v36 = vadd.f32 %v2974_v29, %v2973_v15 }
 0x3de   : > { %v5663_v10 = vadd.f32 %v2975_v36, %v1933_v19  ;;  %v2976_v20 = vpop.f32.mrb[82].mxu1 }
 0x3df   : > { %v2977_v25 = vpop.f32.mrb[83].mxu1 }
 0x3e0   : > { %v2978_v32 = vadd.f32 %v2977_v25, %v2976_v20 }
 0x3e2   : > { %v5667_v3 = vadd.f32 %v2978_v32, %v1938_v58  ;;  %v3011_v45 = vpop.f32.mrb[84].mxu1 }
 0x3e3   : > { %v3012_v35 = vpop.f32.mrb[85].mxu1 }
 0x3e4   : > { %v3013_v56 = vadd.f32 %v3012_v35, %v3011_v45 }
 0x3e6   : > { %v5670_v46 = vadd.f32 %v3013_v56, %v5606_v28  ;;  %v3014_v62 = vpop.f32.mrb[86].mxu1 }
 0x3e7   : > { %v3015_v40 = vpop.f32.mrb[87].mxu1 }
 0x3e8   : > { %v3016_v14 = vadd.f32 %v3015_v40, %v3014_v62 }
 0x3ea   : > { %v5673_v24 = vadd.f32 %v3016_v14, %v5611_v52  ;;  %v3017_v12 = vpop.f32.mrb[88].mxu1 }
 0x3eb   : > { %v3018_v0 = vpop.f32.mrb[89].mxu1 }
 0x3ec   : > { %v3019_v21 = vadd.f32 %v3018_v0, %v3017_v12 }
 0x3ee   : > { %v5676_v9 = vadd.f32 %v3019_v21, %v5615_v16  ;;  %v3020_v43 = vpop.f32.mrb[90].mxu1 }
 0x3ef   : > { %v3021_v54 = vpop.f32.mrb[91].mxu1 }
 0x3f0   : > { %v3022_v39 = vadd.f32 %v3021_v54, %v3020_v43 }
 0x3f2   : > { %v5679_v60 = vadd.f32 %v3022_v39, %v5619_v26  ;;  %v3023_v28 = vpop.f32.mrb[92].mxu1 }
 0x3f3   : > { %v3024_v5 = vpop.f32.mrb[93].mxu1 }
 0x3f4   : > { %v3025_v48 = vadd.f32 %v3024_v5, %v3023_v28 }
 0x3f6   : > { %v5682_v6 = vadd.f32 %v3025_v48, %v5623_v42  ;;  %v3026_v52 = vpop.f32.mrb[94].mxu1 }
 0x3f7   : > { %v3027_v31 = vpop.f32.mrb[95].mxu1 }
 0x3f8   : > { %v3028_v7 = vadd.f32 %v3027_v31, %v3026_v52 }
 0x3fa   : > { %v5685_v47 = vadd.f32 %v3028_v7, %v5627_v49  ;;  %v3029_v16 = vpop.f32.mrb[96].mxu1 }
 0x3fb   : > { %v3030_v59 = vpop.f32.mrb[97].mxu1 }
 0x3fc   : > { %v3031_v17 = vadd.f32 %v3030_v59, %v3029_v16 }
 0x3fe   : > { %v5688_v2 = vadd.f32 %v3031_v17, %v5631_v50  ;;  %v3032_v26 = vpop.f32.mrb[98].mxu1 }
 0x3ff   : > { %v3033_v55 = vpop.f32.mrb[99].mxu1 }
 0x400   : > { %v3034_v53 = vadd.f32 %v3033_v55, %v3032_v26 }
 0x402   : > { %v5691_v1 = vadd.f32 %v3034_v53, %v5635_v57  ;;  %v3035_v42 = vpop.f32.mrb[100].mxu1 }
 0x403   : > { %v3036_v11 = vpop.f32.mrb[101].mxu1 }
 0x404   : > { %v3037_v34 = vadd.f32 %v3036_v11, %v3035_v42 }
 0x406   : > { %v5694_v37 = vadd.f32 %v3037_v34, %v5639_v33  ;;  %v3038_v49 = vpop.f32.mrb[102].mxu1 }
 0x407   : > { %v3039_v41 = vpop.f32.mrb[103].mxu1 }
 0x408   : > { %v3040_v38 = vadd.f32 %v3039_v41, %v3038_v49 }
 0x40a   : > { %v5697_v63 = vadd.f32 %v3040_v38, %v5643_v22  ;;  %v3041_v50 = vpop.f32.mrb[104].mxu1 }
 0x40b   : > { %v3042_v8 = vpop.f32.mrb[105].mxu1 }
 0x40c   : > { %v3043_v61 = vadd.f32 %v3042_v8, %v3041_v50 }
 0x40e   : > { %v5700_v18 = vadd.f32 %v3043_v61, %v5647_v4  ;;  %v3044_v57 = vpop.f32.mrb[106].mxu1 }
 0x40f   : > { %v3045_v30 = vpop.f32.mrb[107].mxu1 }
 0x410   : > { %v3046_v13 = vadd.f32 %v3045_v30, %v3044_v57 }
 0x412   : > { %v5703_v23 = vadd.f32 %v3046_v13, %v5651_v27  ;;  %v3047_v33 = vpop.f32.mrb[108].mxu1 }
 0x413   : > { %v3048_v15 = vpop.f32.mrb[109].mxu1 }
 0x414   : > { %v3049_v29 = vadd.f32 %v3048_v15, %v3047_v33 }
 0x416   : > { %v5706_v19 = vadd.f32 %v3049_v29, %v5655_v51  ;;  %v3050_v22 = vpop.f32.mrb[110].mxu1 }
 0x417   : > { %v3051_v36 = vpop.f32.mrb[111].mxu1 }
 0x418   : > { %v3052_v20 = vadd.f32 %v3051_v36, %v3050_v22 }
 0x41a   : > { %v5709_v25 = vadd.f32 %v3052_v20, %v5659_v44  ;;  %v3053_v4 = vpop.f32.mrb[112].mxu1 }
 0x41b   : > { %v3054_v58 = vpop.f32.mrb[113].mxu1 }
 0x41c   : > { %v3055_v32 = vadd.f32 %v3054_v58, %v3053_v4 }
 0x41e   : > { %v5712_v45 = vadd.f32 %v3055_v32, %v5663_v10  ;;  %v3056_v27 = vpop.f32.mrb[114].mxu1 }
 0x41f   : > { %v3057_v35 = vpop.f32.mrb[115].mxu1 }
 0x420   : > { %v3058_v56 = vadd.f32 %v3057_v35, %v3056_v27 }
 0x422   : > { %v5715_v62 = vadd.f32 %v3058_v56, %v5667_v3  ;;  %v3091_v51 = vpop.f32.mrb[116].mxu1 }
 0x423   : > { %v3092_v40 = vpop.f32.mrb[117].mxu1 }
 0x424   : > { %v3093_v14 = vadd.f32 %v3092_v40, %v3091_v51 }
 0x426   : > { %v3094_v12 = vpop.f32.mrb[118].mxu1  ;;  %v5718_v0 = vadd.f32 %v3093_v14, %v5670_v46 }
 0x427   : > { %v3095_v44 = vpop.f32.mrb[119].mxu1 }
 0x428   : > { %v3096_v21 = vadd.f32 %v3095_v44, %v3094_v12 }
 0x42a   : > { %v3097_v43 = vpop.f32.mrb[120].mxu1  ;;  %v2303_v54 = vadd.f32 %v3096_v21, %v5673_v24 }
 0x42b   : > { %v3098_v10 = vpop.f32.mrb[121].mxu1 }
 0x42c   : > { %v3099_v39 = vadd.f32 %v3098_v10, %v3097_v43 }
 0x42e   : > { %v3100_v28 = vpop.f32.mrb[122].mxu1  ;;  %v5722_v5 = vadd.f32 %v3099_v39, %v5676_v9 }
 0x42f   : > { %v3101_v3 = vpop.f32.mrb[123].mxu1 }
 0x430   : > { %v3102_v48 = vadd.f32 %v3101_v3, %v3100_v28 }
 0x432   : > { %v3103_v52 = vpop.f32.mrb[124].mxu1  ;;  %v2313_v31 = vadd.f32 %v3102_v48, %v5679_v60 }
 0x433   : > { %v3104_v7 = vpop.f32.mrb[125].mxu1 }
 0x434   : > { %v3105_v16 = vadd.f32 %v3104_v7, %v3103_v52 }
 0x436   : > { %v3106_v46 = vpop.f32.mrb[126].mxu1  ;;  %v5726_v59 = vadd.f32 %v3105_v16, %v5682_v6 }
 0x437   : > { %v3107_v17 = vpop.f32.mrb[127].mxu1 }
 0x438   : > { %v3108_v26 = vadd.f32 %v3107_v17, %v3106_v46 }
 0x43a   : > { %v3109_v24 = vpop.f32.mrb[128].mxu1  ;;  %v2323_v55 = vadd.f32 %v3108_v26, %v5685_v47 }
 0x43b   : > { %v3110_v53 = vpop.f32.mrb[129].mxu1 }
 0x43c   : > { %v3111_v42 = vadd.f32 %v3110_v53, %v3109_v24 }
 0x43e   : > { %v3112_v9 = vpop.f32.mrb[130].mxu1  ;;  %v5730_v11 = vadd.f32 %v3111_v42, %v5688_v2 }
 0x43f   : > { %v3113_v34 = vpop.f32.mrb[131].mxu1 }
 0x440   : > { %v3114_v49 = vadd.f32 %v3113_v34, %v3112_v9 }
 0x442   : > { %v3115_v60 = vpop.f32.mrb[132].mxu1  ;;  %v2333_v41 = vadd.f32 %v3114_v49, %v5691_v1 }
 0x443   : > { %v3116_v38 = vpop.f32.mrb[133].mxu1 }
 0x444   : > { %v3117_v50 = vadd.f32 %v3116_v38, %v3115_v60 }
 0x446   : > { %v3118_v6 = vpop.f32.mrb[134].mxu1  ;;  %v5734_v8 = vadd.f32 %v3117_v50, %v5694_v37 }
 0x447   : > { %v3119_v61 = vpop.f32.mrb[135].mxu1 }
 0x448   : > { %v3120_v57 = vadd.f32 %v3119_v61, %v3118_v6 }
 0x44a   : > { %v3121_v47 = vpop.f32.mrb[136].mxu1  ;;  %v2343_v30 = vadd.f32 %v3120_v57, %v5697_v63 }
 0x44b   : > { %v3122_v13 = vpop.f32.mrb[137].mxu1 }
 0x44c   : > { %v3123_v33 = vadd.f32 %v3122_v13, %v3121_v47 }
 0x44e   : > { %v3124_v2 = vpop.f32.mrb[138].mxu1  ;;  %v5738_v15 = vadd.f32 %v3123_v33, %v5700_v18 }
 0x44f   : > { %v3125_v29 = vpop.f32.mrb[139].mxu1 }
 0x450   : > { %v3126_v22 = vadd.f32 %v3125_v29, %v3124_v2 }
 0x452   : > { %v3127_v1 = vpop.f32.mrb[140].mxu1  ;;  %v2353_v36 = vadd.f32 %v3126_v22, %v5703_v23 }
 0x453   : > { %v3128_v20 = vpop.f32.mrb[141].mxu1 }
 0x454   : > { %v3129_v4 = vadd.f32 %v3128_v20, %v3127_v1 }
 0x456   : > { %v3130_v37 = vpop.f32.mrb[142].mxu1  ;;  %v5742_v58 = vadd.f32 %v3129_v4, %v5706_v19 }
 0x457   : > { %v3131_v32 = vpop.f32.mrb[143].mxu1 }
 0x458   : > { %v3132_v27 = vadd.f32 %v3131_v32, %v3130_v37 }
 0x45a   : > { %v3133_v63 = vpop.f32.mrb[144].mxu1  ;;  %v2363_v35 = vadd.f32 %v3132_v27, %v5709_v25 }
 0x45b   : > { %v3134_v56 = vpop.f32.mrb[145].mxu1 }
 0x45c   : > { %v3135_v18 = vadd.f32 %v3134_v56, %v3133_v63 }
 0x45e   : > { %v3136_v51 = vpop.f32.mrb[146].mxu1  ;;  %v5746_v40 = vadd.f32 %v3135_v18, %v5712_v45 }
 0x45f   : > { %v3137_v23 = vpop.f32.mrb[147].mxu1 }
 0x460   : > { %v3138_v14 = vadd.f32 %v3137_v23, %v3136_v51 }
 0x462   : > { %v3267_v12 = vpop.f32.mrb[148].mxu1  ;;  %v2373_v19 = vadd.f32 %v3138_v14, %v5715_v62 }
 0x463   : > { %v2448_v44 = vadd.f32 %v3267_v12, %v2303_v54  ;;  %v2442_v21 = vpop.f32.mrb[149].mxu1 }
 0x464   : > { %v2443_v43 = vadd.f32 %v2442_v21, %v5718_v0 }
 0x465   : > { %v2522_v10 = vmax.f32 %v2448_v44, 0.0 }
 0x466   : > { %v2521_v25 = vmax.f32 %v2443_v43, 0.0  ;;  %v3270_v39 = vpop.f32.mrb[150].mxu1 }
 0x467   : > { %2538 = vst [vmem:[%s3998_s19 + $0x8] sm:$0xff] %v2522_v10  ;;  %v2458_v28 = vadd.f32 %v3270_v39, %v2313_v31  ;;  %v2452_v3 = vpop.f32.mrb[151].mxu1 }
 0x468   : > { %2537 = vst [vmem:[%s3998_s19] sm:$0xff] %v2521_v25  ;;  %v2453_v45 = vadd.f32 %v2452_v3, %v5722_v5 }
 0x469   : > { %v2524_v48 = vmax.f32 %v2458_v28, 0.0 }
 0x46a   : > { %v2523_v52 = vmax.f32 %v2453_v45, 0.0  ;;  %v3273_v7 = vpop.f32.mrb[152].mxu1 }
 0x46b   : > { %2540 = vst [vmem:[%s3998_s19 + $0x18] sm:$0xff] %v2524_v48  ;;  %v2468_v62 = vadd.f32 %v3273_v7, %v2323_v55  ;;  %v2462_v54 = vpop.f32.mrb[153].mxu1 }
 0x46c   : > { %2539 = vst [vmem:[%s3998_s19 + $0x10] sm:$0xff] %v2523_v52  ;;  %v2463_v0 = vadd.f32 %v2462_v54, %v5726_v59 }
 0x46d   : > { %v2526_v16 = vmax.f32 %v2468_v62, 0.0 }
 0x46e   : > { %v2525_v46 = vmax.f32 %v2463_v0, 0.0  ;;  %v3276_v17 = vpop.f32.mrb[154].mxu1 }
 0x46f   : > { %2542 = vst [vmem:[%s3998_s19 + $0x28] sm:$0xff] %v2526_v16  ;;  %v2478_v31 = vadd.f32 %v3276_v17, %v2333_v41  ;;  %v2472_v26 = vpop.f32.mrb[155].mxu1 }
 0x470   : > { %2541 = vst [vmem:[%s3998_s19 + $0x20] sm:$0xff] %v2525_v46  ;;  %v2473_v5 = vadd.f32 %v2472_v26, %v5730_v11 }
 0x471   : > { %v2528_v24 = vmax.f32 %v2478_v31, 0.0 }
 0x472   : > { %v2527_v53 = vmax.f32 %v2473_v5, 0.0  ;;  %v3279_v42 = vpop.f32.mrb[156].mxu1 }
 0x473   : > { %2544 = vst [vmem:[%s3998_s19 + $0x38] sm:$0xff] %v2528_v24  ;;  %v2488_v55 = vadd.f32 %v3279_v42, %v2343_v30  ;;  %v2482_v9 = vpop.f32.mrb[157].mxu1 }
 0x474   : > { %2543 = vst [vmem:[%s3998_s19 + $0x30] sm:$0xff] %v2527_v53  ;;  %v2483_v59 = vadd.f32 %v2482_v9, %v5734_v8 }
 0x475   : > { %v2530_v34 = vmax.f32 %v2488_v55, 0.0 }
 0x476   : > { %v2529_v49 = vmax.f32 %v2483_v59, 0.0  ;;  %v3282_v60 = vpop.f32.mrb[158].mxu1 }
 0x477   : > { %2546 = vst [vmem:[%s3998_s19 + $0x48] sm:$0xff] %v2530_v34  ;;  %v2498_v41 = vadd.f32 %v3282_v60, %v2353_v36  ;;  %v2492_v38 = vpop.f32.mrb[159].mxu1 }
 0x478   : > { %2545 = vst [vmem:[%s3998_s19 + $0x40] sm:$0xff] %v2529_v49  ;;  %v2493_v11 = vadd.f32 %v2492_v38, %v5738_v15 }
 0x479   : > { %v2532_v50 = vmax.f32 %v2498_v41, 0.0 }
 0x47a   : > { %v2531_v6 = vmax.f32 %v2493_v11, 0.0  ;;  %v3285_v61 = vpop.f32.mrb[160].mxu1 }
 0x47b   : > { %2548 = vst [vmem:[%s3998_s19 + $0x58] sm:$0xff] %v2532_v50  ;;  %v2508_v57 = vadd.f32 %v3285_v61, %v2363_v35  ;;  %v2502_v47 = vpop.f32.mrb[161].mxu1 }
 0x47c   : > { %2547 = vst [vmem:[%s3998_s19 + $0x50] sm:$0xff] %v2531_v6  ;;  %v2503_v8 = vadd.f32 %v2502_v47, %v5742_v58 }
 0x47d   : > { %v2534_v30 = vmax.f32 %v2508_v57, 0.0 }
 0x47e   : > { %v2533_v13 = vmax.f32 %v2503_v8, 0.0  ;;  %v3288_v33 = vpop.f32.mrb[162].mxu1 }
 0x47f   : > { %2550 = vst [vmem:[%s3998_s19 + $0x68] sm:$0xff] %v2534_v30  ;;  %v2518_v2 = vadd.f32 %v3288_v33, %v2373_v19  ;;  %v2512_v29 = vpop.f32.mrb[163].mxu1 }
 0x480   : > { %2549 = vst [vmem:[%s3998_s19 + $0x60] sm:$0xff] %v2533_v13  ;;  %v2513_v15 = vadd.f32 %v2512_v29, %v5746_v40 }
 0x481   : > { %v2536_v22 = vmax.f32 %v2518_v2, 0.0 }
 0x482   : > { %v2535_v1 = vmax.f32 %v2513_v15, 0.0 }
 0x483   : > { %2552 = vst [vmem:[%s3998_s19 + $0x78] sm:$0xff] %v2536_v22 }
 0x484   : > { %2551 = vst [vmem:[%s3998_s19 + $0x70] sm:$0xff] %v2535_v1 }
 0x485 PF: > { %s15_s22 = sadd.s32 1, %s3896_s22   ;;  %s5794_s18 = smov %s3888_s20 }
 0x486   : > { %p12_p10 = scmp.ge.s32.totalorder %s15_s22, 6   ;;  %s5795_s19 = smov %s3892_s21 }
 0x487   : > { %s5796_s20 = smov %s5799_s23  ;;  %s5797_s21 = smov %s5803_s24 }
 0x488   :  { %14 = sbr.rel (!%p12_p10) target bundleno = 3 (0x3), region = 83 }

</bundles_post_ra>
